<compile_context>
chip_gen: v6e
topology: v6e:2x2x1
jax: 0.10.0
libtpu: 0.0.40
codegen_flags: <defaults>
</compile_context>

<pallas_src>
import functools

import jax
import jax.numpy as jnp
import numpy as np
from jax import lax
from jax.experimental import pallas as pl
from jax.experimental.pallas import tpu as pltpu


# ----------------------------- shared math helpers -----------------------------

def softplus(x):
    # Matches torch.nn.functional.softplus (beta=1, threshold=20).
    return jnp.where(x > 20.0, x, jnp.log1p(jnp.exp(jnp.minimum(x, 20.0))))


OUT_LANES = 128    # packed output: lane 0 = df, 1 = loc, 2 = scale, rest zero


# --------------------------------- Pallas kernel --------------------------------

def deepar_encoder_kernel(seq_ref, tf_ref,
                          wemb_ref, bemb_ref,
                          wihl_ref, wihe_ref, whh_ref, bih_ref, bhh_ref,
                          wproj_ref, bproj_ref,
                          out_ref, scale_ref,
                          gi_scr, h_scr,
                          *, hist_len, cntx_len):
    """Fused DeepAR encoder for one batch tile.

    seq_ref  : (bt, seq_len) f32   raw concatenated [x; y] series (channel squeezed)
    tf_ref   : (T, bt, F)    f32   raw time features, time-major
    wemb_ref : (F, E) bf16, bemb_ref (1, E) f32
    wihl_ref : (L, 3H) bf16   input->hidden lag rows, REVERSED lag order
    wihe_ref : (E, 3H) bf16   input->hidden embedding rows
    whh_ref  : (H, 3H) bf16, bih/bhh (1, 3H) f32   [gate order r, z, n]
    wproj_ref: (H, 128) bf16, bproj_ref (1, 128) f32   zero-padded past column 2
    out_ref  : (bt, T*128) f32   batch-major; lanes [t*128, t*128+3) = df/loc/scale
    scale_ref: (bt, 1) f32       mean-abs scale
    gi_scr   : VMEM (T*bt, 3H) f32, h_scr: VMEM (T*bt, H) f32
    """
    T, bt, F = tf_ref.shape
    L = wihl_ref.shape[0]
    H = whh_ref.shape[0]
    P = wproj_ref.shape[1]
    bf = jnp.bfloat16

    # ---- mean-abs scaling over the context window (once per tile) ----
    seq = seq_ref[...]                                            # (bt, seq_len) f32
    xctx = seq[:, hist_len - cntx_len:hist_len]                   # (bt, cntx_len)
    scale = jnp.maximum(jnp.mean(jnp.abs(xctx), axis=1, keepdims=True), 1e-5)
    scale_ref[...] = scale
    inv_scale = pl.reciprocal(scale, approx=True)                 # EUP slot, ~free
    seq_scaled = seq * inv_scale                                  # scale folded once

    # ---- in-kernel im2col of the lag windows (static lane-window slices) ----
    # Row block t of lags2 is seq_scaled[:, t : t+L]; the lag-order reversal is
    # already folded into the reversed w_ih lag rows passed from the wrapper.
    lags2 = jnp.concatenate([seq_scaled[:, t:t + L] for t in range(T)], axis=0)  # (T*bt, L)

    # ---- hoisted input->hidden path: batched (T*bt) matmuls, bf16 MXU operands ----
    tf2 = tf_ref[...].reshape(T * bt, F)
    emb = jnp.dot(tf2.astype(bf), wemb_ref[...],
                  preferred_element_type=jnp.float32) + bemb_ref[...]
    gi_scr[...] = (jnp.dot(lags2.astype(bf), wihl_ref[...],
                           preferred_element_type=jnp.float32)
                   + jnp.dot(emb.astype(bf), wihe_ref[...],
                             preferred_element_type=jnp.float32)
                   + bih_ref[...])                                # b_ih folded here

    whh = whh_ref[...]   # bf16
    bhh = bhh_ref[...]   # f32; stays per-step: n-gate term must be r * (h@W_hn + b_hn)

    # ---- GRU recurrence (PyTorch semantics), fully unrolled (T static & small) ----
    h = jnp.zeros((bt, H), jnp.float32)
    for t in range(T):                                 # full unroll: static indices
        r0 = t * bt
        gi_t = gi_scr[r0:r0 + bt, :]                   # (bt, 3H) contiguous
        gh = jnp.dot(h.astype(bf), whh, preferred_element_type=jnp.float32) + bhh
        r = jax.nn.sigmoid(gi_t[:, 0:H] + gh[:, 0:H])
        z = jax.nn.sigmoid(gi_t[:, H:2 * H] + gh[:, H:2 * H])
        n = jnp.tanh(gi_t[:, 2 * H:3 * H] + r * gh[:, 2 * H:3 * H])
        h = (1.0 - z) * n + z * h
        h_scr[r0:r0 + bt, :] = h

    # ---- deferred projection + StudentT domain map ----
    p = jnp.dot(h_scr[...].astype(bf), wproj_ref[...],
                preferred_element_type=jnp.float32) + bproj_ref[...]   # (T*bt, P)
    col = lax.broadcasted_iota(jnp.int32, p.shape, 1)
    sp = softplus(p)
    res = jnp.where(col == 0, 2.0 + sp, jnp.where(col == 2, sp, p))    # df | loc | scale | 0

    # ---- batch-major, 128-lane-aligned stores (no wrapper transpose needed) ----
    for t in range(T):
        out_ref[:, t * P:(t + 1) * P] = res[t * bt:(t + 1) * bt, :]


# ----------------------------------- wrapper ------------------------------------

def _pick_batch_tiling(B):
    """Pick (batch_tile, grid_steps): tile is a multiple of 8 (<=128 sublanes) and
    the grid keeps >=2 'parallel' steps whenever B allows (feeds both v7x TCs)."""
    grid_n = max(1, -(-B // 128))
    if B > 8 and grid_n < 2:
        grid_n = 2
    bt = ((max(8, -(-B // grid_n)) + 7) // 8) * 8
    return bt, grid_n


def deepar_forward_pallas(params, x, x_mark, y, y_mark, *,
                          hist_len, cntx_len, pred_len):
    """mode=True forward: returns StudentT params (df, loc, scale) and the affine scale."""
    B, _, c_in = x.shape
    assert c_in == 1, "DeepAR RNN input_size formula implies c_in == 1"
    sub_len = cntx_len + pred_len
    seq_len = hist_len + pred_len
    L = seq_len - sub_len                     # == hist_len - cntx_len (c_in == 1)
    T = sub_len
    H = params["w_hh"].shape[0]
    F = params["w_emb"].shape[0]
    E = params["w_emb"].shape[1]
    P = OUT_LANES
    bf = jnp.bfloat16

    time_feat = jnp.concatenate([x_mark[:, hist_len - cntx_len:], y_mark], axis=1)  # (B, T, F)
    sequence = jnp.concatenate([x, y], axis=1)[:, :, 0]                             # (B, seq_len)

    seq_bm = sequence.astype(jnp.float32)                                           # (B, seq_len)
    tf_tm = jnp.transpose(time_feat, (1, 0, 2)).astype(jnp.float32)                 # (T, B, F) tiny

    bt, grid_n = _pick_batch_tiling(B)
    B_pad = bt * grid_n
    pad = B_pad - B
    if pad:
        seq_bm = jnp.pad(seq_bm, ((0, pad), (0, 0)))     # zero rows are inert, sliced off
        tf_tm = jnp.pad(tf_tm, ((0, 0), (0, pad), (0, 0)))

    # weights: bf16 MXU operands; biases stay f32 (added post-matmul)
    w_emb = params["w_emb"].astype(bf)
    b_emb = params["b_emb"].astype(jnp.float32)
    w_ih_l = params["w_ih"][:L][::-1].astype(bf)          # reversed lag rows (im2col order)
    w_ih_e = params["w_ih"][L:].astype(bf)
    w_hh = params["w_hh"].astype(bf)
    b_ih = params["b_ih"].astype(jnp.float32)
    b_hh = params["b_hh"].astype(jnp.float32)
    w_proj = jnp.pad(params["w_proj"].astype(jnp.float32), ((0, 0), (0, P - 3))).astype(bf)
    b_proj = jnp.pad(params["b_proj"].astype(jnp.float32), ((0, 0), (0, P - 3)))

    kernel = functools.partial(deepar_encoder_kernel, hist_len=hist_len, cntx_len=cntx_len)
    rep2 = lambda b: (0, 0)     # replicated 2-D weights

    grid_spec = pltpu.PrefetchScalarGridSpec(
        num_scalar_prefetch=0,
        grid=(grid_n,),
        in_specs=[
            pl.BlockSpec((bt, seq_len), lambda b: (b, 0)),        # raw sequence
            pl.BlockSpec((T, bt, F), lambda b: (0, b, 0)),        # time feats (time-major)
            pl.BlockSpec((F, E), rep2),                           # w_emb (bf16)
            pl.BlockSpec((1, E), rep2),                           # b_emb
            pl.BlockSpec((L, 3 * H), rep2),                       # w_ih lag rows (reversed, bf16)
            pl.BlockSpec((E, 3 * H), rep2),                       # w_ih emb rows (bf16)
            pl.BlockSpec((H, 3 * H), rep2),                       # w_hh (bf16)
            pl.BlockSpec((1, 3 * H), rep2),                       # b_ih
            pl.BlockSpec((1, 3 * H), rep2),                       # b_hh
            pl.BlockSpec((H, P), rep2),                           # w_proj (padded, bf16)
            pl.BlockSpec((1, P), rep2),                           # b_proj (padded)
        ],
        out_specs=(
            pl.BlockSpec((bt, T * P), lambda b: (b, 0)),          # packed df/loc/scale, batch-major
            pl.BlockSpec((bt, 1), lambda b: (b, 0)),              # mean-abs scale
        ),
        scratch_shapes=[
            pltpu.VMEM((T * bt, 3 * H), jnp.float32),             # hoisted gi
            pltpu.VMEM((T * bt, H), jnp.float32),                 # hidden states
        ],
    )

    out, scale = pl.pallas_call(
        kernel,
        out_shape=(jax.ShapeDtypeStruct((B_pad, T * P), jnp.float32),
                   jax.ShapeDtypeStruct((B_pad, 1), jnp.float32)),
        grid_spec=grid_spec,
        compiler_params=pltpu.CompilerParams(dimension_semantics=("parallel",)),
    )(seq_bm, tf_tm,
      w_emb, b_emb, w_ih_l, w_ih_e, w_hh, b_ih, b_hh, w_proj, b_proj)

    # batch-major already: drop padding, free row-major reshape, unpack lanes 0..2
    out_bf = out[:B].reshape(B, T, P)
    df = out_bf[..., 0:1]
    loc = out_bf[..., 1:2]
    sc = out_bf[..., 2:3]
    affine_scale = scale[:B][:, None, :]           # (B, 1, c_in) — AffineTransform scale
    return df, loc, sc, affine_scale


# ------------------------------ pure-JAX reference -------------------------------

def _build_lags(sequence, sequence_len, subsequence_len):
    # get_lagged_subsequences_by_default(..., mode=True)
    lagged = []
    for i in range(1, sequence_len - subsequence_len + 1):
        lagged.append(sequence[:, -i - subsequence_len: -i, :])
    return jnp.stack(lagged, axis=-1)  # (B, sub_len, c_in, num_lags)


def deepar_forward_ref(params, x, x_mark, y, y_mark, *, hist_len, cntx_len, pred_len):
    B, _, c_in = x.shape
    sub_len = cntx_len + pred_len
    seq_len = hist_len + pred_len
    H = params["w_hh"].shape[0]

    time_feat = jnp.concatenate([x_mark[:, hist_len - cntx_len:], y_mark], axis=1)
    sequence = jnp.concatenate([x, y], axis=1)
    lags = _build_lags(sequence, seq_len, sub_len)                        # (B, sub, c_in, L)

    tf_emb = time_feat @ params["w_emb"] + params["b_emb"]                # (B, sub, E)
    scale = jnp.maximum(jnp.mean(jnp.abs(x[:, -cntx_len:, :]), axis=1),
                        1e-5)[:, None, :]                                 # (B, 1, c_in)
    lags_scale = lags / scale[..., None]
    input_lags = lags_scale.reshape(B, sub_len, -1)
    inputs = jnp.concatenate([input_lags, tf_emb[:, -sub_len:]], axis=-1)

    h = jnp.zeros((B, H), jnp.float32)
    outs = []
    for t in range(sub_len):
        x_t = inputs[:, t]
        gi = x_t @ params["w_ih"] + params["b_ih"]
        gh = h @ params["w_hh"] + params["b_hh"]
        r = jax.nn.sigmoid(gi[:, :H] + gh[:, :H])
        z = jax.nn.sigmoid(gi[:, H:2 * H] + gh[:, H:2 * H])
        n = jnp.tanh(gi[:, 2 * H:] + r * gh[:, 2 * H:])
        h = (1.0 - z) * n + z * h
        outs.append(h)
    rnn_out = jnp.stack(outs, axis=1)                                     # (B, sub, H)

    p = rnn_out @ params["w_proj"] + params["b_proj"]                     # (B, sub, 3)
    df = 2.0 + softplus(p[..., 0:1])
    loc = p[..., 1:2]
    sc = softplus(p[..., 2:3])
    return df, loc, sc, scale


# ------------------------------------- main --------------------------------------

if __name__ == "__main__":
    # Module hyper-parameters (small, consistent with DeepAR.__init__)
    c_in = c_out = 1
    hist_len, cntx_len, pred_len = 12, 8, 4
    hidden_size = 32
    embedding_dim = 4
    freq_dim = 5                      # freq='H' -> freq_map['H'] = 5
    E = embedding_dim * freq_dim      # self.embedding_dim
    L = hist_len - cntx_len           # lag features (c_in == 1)
    I = E + L                         # GRU input_size
    H = hidden_size
    B = 2

    key = jax.random.PRNGKey(0)
    ks = jax.random.split(key, 12)

    def init(k, shape, s=0.1):
        return (s * jax.random.normal(k, shape)).astype(jnp.float32)

    params = {
        # nn.Linear(freq_dim, E) — stored transposed (in, out)
        "w_emb": init(ks[0], (freq_dim, E)),
        "b_emb": init(ks[1], (1, E)),
        # GRU weights (PyTorch gate order r, z, n), stored transposed
        "w_ih": init(ks[2], (I, 3 * H)),
        "w_hh": init(ks[3], (H, 3 * H)),
        "b_ih": init(ks[4], (1, 3 * H)),
        "b_hh": init(ks[5], (1, 3 * H)),
        # args_proj: three Linear(H, 1) fused -> columns [df, loc, scale]
        "w_proj": init(ks[6], (H, 3)),
        "b_proj": init(ks[7], (1, 3)),
    }

    x = init(ks[8], (B, hist_len, c_in), s=1.0)
    x_mark = init(ks[9], (B, hist_len, freq_dim), s=1.0)
    y = init(ks[10], (B, pred_len, c_in), s=1.0)
    y_mark = init(ks[11], (B, pred_len, freq_dim), s=1.0)

    out = deepar_forward_pallas(params, x, x_mark, y, y_mark,
                                hist_len=hist_len, cntx_len=cntx_len, pred_len=pred_len)
    out = jax.block_until_ready(out)

    ref = deepar_forward_ref(params, x, x_mark, y, y_mark,
                             hist_len=hist_len, cntx_len=cntx_len, pred_len=pred_len)
    ref = jax.block_until_ready(ref)

    # Tolerance accounts for bf16 MXU operands (f32 accumulation) and the EUP
    # approx reciprocal vs the pure-f32 reference.
    names = ["df", "loc", "scale_param", "affine_scale"]
    for name, a, b in zip(names, out, ref):
        assert a.shape == b.shape, (name, a.shape, b.shape)
        np.testing.assert_allclose(np.asarray(a), np.asarray(b), rtol=5e-2, atol=5e-2)

    print("KERNEL_OK")
</pallas_src>

<mosaic_0001>
module attributes {stable_mosaic.version = 11 : i64} {
  func.func @deepar_encoder_kernel(%arg0: i32, %arg1: memref<8x16xf32, #tpu.memory_space<vmem>>, %arg2: memref<12x8x5xf32, #tpu.memory_space<vmem>>, %arg3: memref<5x20xbf16, #tpu.memory_space<vmem>>, %arg4: memref<1x20xf32, #tpu.memory_space<vmem>>, %arg5: memref<4x96xbf16, #tpu.memory_space<vmem>>, %arg6: memref<20x96xbf16, #tpu.memory_space<vmem>>, %arg7: memref<32x96xbf16, #tpu.memory_space<vmem>>, %arg8: memref<1x96xf32, #tpu.memory_space<vmem>>, %arg9: memref<1x96xf32, #tpu.memory_space<vmem>>, %arg10: memref<32x128xbf16, #tpu.memory_space<vmem>>, %arg11: memref<1x128xf32, #tpu.memory_space<vmem>>, %arg12: memref<8x1536xf32, #tpu.memory_space<vmem>>, %arg13: memref<8x1xf32, #tpu.memory_space<vmem>>, %arg14: memref<96x96xf32, #tpu.memory_space<vmem>>, %arg15: memref<96x32xf32, #tpu.memory_space<vmem>>) attributes {dimension_semantics = [#tpu.dimension_semantics<parallel>], iteration_bounds = array<i64: 1>, scalar_prefetch = 0 : i64, scratch_operands = 2 : i64, tpu.core_type = #tpu.core_type<tc>, window_params = [{transform_indices = @transform_0, window_bounds = array<i64: 8, 16>}, {transform_indices = @transform_1, window_bounds = array<i64: 12, 8, 5>}, {pipeline_mode = #tpu.pipeline_mode<synchronous>, transform_indices = @transform_2, window_bounds = array<i64: 5, 20>}, {pipeline_mode = #tpu.pipeline_mode<synchronous>, transform_indices = @transform_3, window_bounds = array<i64: 1, 20>}, {pipeline_mode = #tpu.pipeline_mode<synchronous>, transform_indices = @transform_4, window_bounds = array<i64: 4, 96>}, {pipeline_mode = #tpu.pipeline_mode<synchronous>, transform_indices = @transform_5, window_bounds = array<i64: 20, 96>}, {pipeline_mode = #tpu.pipeline_mode<synchronous>, transform_indices = @transform_6, window_bounds = array<i64: 32, 96>}, {pipeline_mode = #tpu.pipeline_mode<synchronous>, transform_indices = @transform_7, window_bounds = array<i64: 1, 96>}, {pipeline_mode = #tpu.pipeline_mode<synchronous>, transform_indices = @transform_8, window_bounds = array<i64: 1, 96>}, {pipeline_mode = #tpu.pipeline_mode<synchronous>, transform_indices = @transform_9, window_bounds = array<i64: 32, 128>}, {pipeline_mode = #tpu.pipeline_mode<synchronous>, transform_indices = @transform_10, window_bounds = array<i64: 1, 128>}, {transform_indices = @transform_11, window_bounds = array<i64: 8, 1536>}, {transform_indices = @transform_12, window_bounds = array<i64: 8, 1>}]} {
    %c0 = arith.constant 0 : index
    %c0_0 = arith.constant 0 : index
    %0 = vector.load %arg1[%c0, %c0_0] : memref<8x16xf32, #tpu.memory_space<vmem>>, vector<8x16xf32>
    %1 = vector.extract_strided_slice %0 {offsets = [0, 4], sizes = [8, 8], strides = [1, 1]} : vector<8x16xf32> to vector<8x8xf32>
    %2 = math.absf %1 : vector<8x8xf32>
    %cst = arith.constant dense<0.000000e+00> : vector<8xf32>
    %3 = vector.multi_reduction <add>, %2, %cst [1] : vector<8x8xf32> to vector<8xf32>
    %4 = vector.shape_cast %3 : vector<8xf32> to vector<8x1xf32>
    %cst_1 = arith.constant 8.000000e+00 : f32
    %5 = vector.broadcast %cst_1 : f32 to vector<8x1xf32>
    %6 = arith.divf %4, %5 : vector<8x1xf32>
    %cst_2 = arith.constant 9.99999974E-6 : f32
    %7 = vector.broadcast %cst_2 : f32 to vector<8x1xf32>
    %8 = arith.maximumf %6, %7 : vector<8x1xf32>
    %c0_3 = arith.constant 0 : index
    %c0_4 = arith.constant 0 : index
    %9 = vector.load %arg13[%c0_3, %c0_4] : memref<8x1xf32, #tpu.memory_space<vmem>>, vector<8x1xf32>
    tpu.vector_store %arg13[%c0_3, %c0_4], %8 {strides = array<i32>} : memref<8x1xf32, #tpu.memory_space<vmem>>, vector<8x1xf32>,
    %10 = tpu.reciprocal %8 {approx = true} : vector<8x1xf32> -> vector<8x1xf32>
    %11 = vector.broadcast %10 : vector<8x1xf32> to vector<8x16xf32>
    %12 = arith.mulf %0, %11 : vector<8x16xf32>
    %13 = vector.extract_strided_slice %12 {offsets = [0, 0], sizes = [8, 4], strides = [1, 1]} : vector<8x16xf32> to vector<8x4xf32>
    %14 = vector.extract_strided_slice %12 {offsets = [0, 1], sizes = [8, 4], strides = [1, 1]} : vector<8x16xf32> to vector<8x4xf32>
    %15 = vector.extract_strided_slice %12 {offsets = [0, 2], sizes = [8, 4], strides = [1, 1]} : vector<8x16xf32> to vector<8x4xf32>
    %16 = vector.extract_strided_slice %12 {offsets = [0, 3], sizes = [8, 4], strides = [1, 1]} : vector<8x16xf32> to vector<8x4xf32>
    %17 = vector.extract_strided_slice %12 {offsets = [0, 4], sizes = [8, 4], strides = [1, 1]} : vector<8x16xf32> to vector<8x4xf32>
    %18 = vector.extract_strided_slice %12 {offsets = [0, 5], sizes = [8, 4], strides = [1, 1]} : vector<8x16xf32> to vector<8x4xf32>
    %19 = vector.extract_strided_slice %12 {offsets = [0, 6], sizes = [8, 4], strides = [1, 1]} : vector<8x16xf32> to vector<8x4xf32>
    %20 = vector.extract_strided_slice %12 {offsets = [0, 7], sizes = [8, 4], strides = [1, 1]} : vector<8x16xf32> to vector<8x4xf32>
    %21 = vector.extract_strided_slice %12 {offsets = [0, 8], sizes = [8, 4], strides = [1, 1]} : vector<8x16xf32> to vector<8x4xf32>
    %22 = vector.extract_strided_slice %12 {offsets = [0, 9], sizes = [8, 4], strides = [1, 1]} : vector<8x16xf32> to vector<8x4xf32>
    %23 = vector.extract_strided_slice %12 {offsets = [0, 10], sizes = [8, 4], strides = [1, 1]} : vector<8x16xf32> to vector<8x4xf32>
    %24 = vector.extract_strided_slice %12 {offsets = [0, 11], sizes = [8, 4], strides = [1, 1]} : vector<8x16xf32> to vector<8x4xf32>
    %25 = tpu.concatenate %13, %14, %15, %16, %17, %18, %19, %20, %21, %22, %23, %24 in 0 : vector<8x4xf32>, vector<8x4xf32>, vector<8x4xf32>, vector<8x4xf32>, vector<8x4xf32>, vector<8x4xf32>, vector<8x4xf32>, vector<8x4xf32>, vector<8x4xf32>, vector<8x4xf32>, vector<8x4xf32>, vector<8x4xf32> -> vector<96x4xf32>
    %c0_5 = arith.constant 0 : index
    %c0_6 = arith.constant 0 : index
    %c0_7 = arith.constant 0 : index
    %26 = vector.load %arg2[%c0_5, %c0_6, %c0_7] : memref<12x8x5xf32, #tpu.memory_space<vmem>>, vector<12x8x5xf32>
    %27 = vector.shape_cast %26 : vector<12x8x5xf32> to vector<96x5xf32>
    %28 = arith.truncf %27 : vector<96x5xf32> to vector<96x5xbf16>
    %c0_8 = arith.constant 0 : index
    %c0_9 = arith.constant 0 : index
    %29 = vector.load %arg3[%c0_8, %c0_9] : memref<5x20xbf16, #tpu.memory_space<vmem>>, vector<5x20xbf16>
    %cst_10 = arith.constant dense<0.000000e+00> : vector<96x20xf32>
    %30 = tpu.matmul %28, %29, %cst_10 {dimension_numbers = #tpu.dot_dimension_numbers<[1], [0], [0], [1], [0, 0, 1, 1], [], []>} : vector<96x5xbf16>, vector<5x20xbf16>, vector<96x20xf32> -> vector<96x20xf32>
    %c0_11 = arith.constant 0 : index
    %c0_12 = arith.constant 0 : index
    %31 = vector.load %arg4[%c0_11, %c0_12] : memref<1x20xf32, #tpu.memory_space<vmem>>, vector<1x20xf32>
    %32 = vector.broadcast %31 : vector<1x20xf32> to vector<96x20xf32>
    %33 = arith.addf %30, %32 : vector<96x20xf32>
    %34 = arith.truncf %25 : vector<96x4xf32> to vector<96x4xbf16>
    %c0_13 = arith.constant 0 : index
    %c0_14 = arith.constant 0 : index
    %35 = vector.load %arg5[%c0_13, %c0_14] : memref<4x96xbf16, #tpu.memory_space<vmem>>, vector<4x96xbf16>
    %cst_15 = arith.constant dense<0.000000e+00> : vector<96x96xf32>
    %36 = tpu.matmul %34, %35, %cst_15 {dimension_numbers = #tpu.dot_dimension_numbers<[1], [0], [0], [1], [0, 0, 1, 1], [], []>} : vector<96x4xbf16>, vector<4x96xbf16>, vector<96x96xf32> -> vector<96x96xf32>
    %37 = arith.truncf %33 : vector<96x20xf32> to vector<96x20xbf16>
    %c0_16 = arith.constant 0 : index
    %c0_17 = arith.constant 0 : index
    %38 = vector.load %arg6[%c0_16, %c0_17] : memref<20x96xbf16, #tpu.memory_space<vmem>>, vector<20x96xbf16>
    %cst_18 = arith.constant dense<0.000000e+00> : vector<96x96xf32>
    %39 = tpu.matmul %37, %38, %cst_18 {dimension_numbers = #tpu.dot_dimension_numbers<[1], [0], [0], [1], [0, 0, 1, 1], [], []>} : vector<96x20xbf16>, vector<20x96xbf16>, vector<96x96xf32> -> vector<96x96xf32>
    %40 = arith.addf %36, %39 : vector<96x96xf32>
    %c0_19 = arith.constant 0 : index
    %c0_20 = arith.constant 0 : index
    %41 = vector.load %arg8[%c0_19, %c0_20] : memref<1x96xf32, #tpu.memory_space<vmem>>, vector<1x96xf32>
    %42 = vector.broadcast %41 : vector<1x96xf32> to vector<96x96xf32>
    %43 = arith.addf %40, %42 : vector<96x96xf32>
    %c0_21 = arith.constant 0 : index
    %c0_22 = arith.constant 0 : index
    %44 = vector.load %arg14[%c0_21, %c0_22] : memref<96x96xf32, #tpu.memory_space<vmem>>, vector<96x96xf32>
    tpu.vector_store %arg14[%c0_21, %c0_22], %43 {strides = array<i32>} : memref<96x96xf32, #tpu.memory_space<vmem>>, vector<96x96xf32>,
    %c0_23 = arith.constant 0 : index
    %c0_24 = arith.constant 0 : index
    %45 = vector.load %arg7[%c0_23, %c0_24] : memref<32x96xbf16, #tpu.memory_space<vmem>>, vector<32x96xbf16>
    %c0_25 = arith.constant 0 : index
    %c0_26 = arith.constant 0 : index
    %46 = vector.load %arg9[%c0_25, %c0_26] : memref<1x96xf32, #tpu.memory_space<vmem>>, vector<1x96xf32>
    %cst_27 = arith.constant 0.000000e+00 : f32
    %47 = vector.broadcast %cst_27 : f32 to vector<8x32xf32>
    %c0_28 = arith.constant 0 : index
    %c0_29 = arith.constant 0 : index
    %48 = vector.load %arg14[%c0_28, %c0_29] : memref<96x96xf32, #tpu.memory_space<vmem>>, vector<8x96xf32>
    %49 = arith.truncf %47 : vector<8x32xf32> to vector<8x32xbf16>
    %cst_30 = arith.constant dense<0.000000e+00> : vector<8x96xf32>
    %50 = tpu.matmul %49, %45, %cst_30 {dimension_numbers = #tpu.dot_dimension_numbers<[1], [0], [0], [1], [0, 0, 1, 1], [], []>} : vector<8x32xbf16>, vector<32x96xbf16>, vector<8x96xf32> -> vector<8x96xf32>
    %51 = vector.broadcast %46 : vector<1x96xf32> to vector<8x96xf32>
    %52 = arith.addf %50, %51 : vector<8x96xf32>
    %53 = vector.extract_strided_slice %48 {offsets = [0, 0], sizes = [8, 32], strides = [1, 1]} : vector<8x96xf32> to vector<8x32xf32>
    %54 = vector.extract_strided_slice %52 {offsets = [0, 0], sizes = [8, 32], strides = [1, 1]} : vector<8x96xf32> to vector<8x32xf32>
    %55 = arith.addf %53, %54 : vector<8x32xf32>
    %56 = arith.negf %55 : vector<8x32xf32>
    %57 = math.exp %56 : vector<8x32xf32>
    %cst_31 = arith.constant 1.000000e+00 : f32
    %58 = vector.broadcast %cst_31 : f32 to vector<8x32xf32>
    %59 = arith.addf %58, %57 : vector<8x32xf32>
    %60 = arith.divf %58, %59 : vector<8x32xf32>
    %61 = vector.extract_strided_slice %48 {offsets = [0, 32], sizes = [8, 32], strides = [1, 1]} : vector<8x96xf32> to vector<8x32xf32>
    %62 = vector.extract_strided_slice %52 {offsets = [0, 32], sizes = [8, 32], strides = [1, 1]} : vector<8x96xf32> to vector<8x32xf32>
    %63 = arith.addf %61, %62 : vector<8x32xf32>
    %64 = arith.negf %63 : vector<8x32xf32>
    %65 = math.exp %64 : vector<8x32xf32>
    %cst_32 = arith.constant 1.000000e+00 : f32
    %66 = vector.broadcast %cst_32 : f32 to vector<8x32xf32>
    %67 = arith.addf %66, %65 : vector<8x32xf32>
    %68 = arith.divf %66, %67 : vector<8x32xf32>
    %69 = vector.extract_strided_slice %48 {offsets = [0, 64], sizes = [8, 32], strides = [1, 1]} : vector<8x96xf32> to vector<8x32xf32>
    %70 = vector.extract_strided_slice %52 {offsets = [0, 64], sizes = [8, 32], strides = [1, 1]} : vector<8x96xf32> to vector<8x32xf32>
    %71 = arith.mulf %60, %70 : vector<8x32xf32>
    %72 = arith.addf %69, %71 : vector<8x32xf32>
    %73 = math.tanh %72 : vector<8x32xf32>
    %cst_33 = arith.constant 1.000000e+00 : f32
    %74 = vector.broadcast %cst_33 : f32 to vector<8x32xf32>
    %75 = arith.subf %74, %68 : vector<8x32xf32>
    %76 = arith.mulf %75, %73 : vector<8x32xf32>
    %77 = arith.mulf %68, %47 : vector<8x32xf32>
    %78 = arith.addf %76, %77 : vector<8x32xf32>
    %c0_34 = arith.constant 0 : index
    %c0_35 = arith.constant 0 : index
    %79 = vector.load %arg15[%c0_34, %c0_35] : memref<96x32xf32, #tpu.memory_space<vmem>>, vector<8x32xf32>
    tpu.vector_store %arg15[%c0_34, %c0_35], %78 {strides = array<i32>} : memref<96x32xf32, #tpu.memory_space<vmem>>, vector<8x32xf32>,
    %c8 = arith.constant 8 : index
    %c0_36 = arith.constant 0 : index
    %80 = vector.load %arg14[%c8, %c0_36] : memref<96x96xf32, #tpu.memory_space<vmem>>, vector<8x96xf32>
    %81 = arith.truncf %78 : vector<8x32xf32> to vector<8x32xbf16>
    %cst_37 = arith.constant dense<0.000000e+00> : vector<8x96xf32>
    %82 = tpu.matmul %81, %45, %cst_37 {dimension_numbers = #tpu.dot_dimension_numbers<[1], [0], [0], [1], [0, 0, 1, 1], [], []>} : vector<8x32xbf16>, vector<32x96xbf16>, vector<8x96xf32> -> vector<8x96xf32>
    %83 = vector.broadcast %46 : vector<1x96xf32> to vector<8x96xf32>
    %84 = arith.addf %82, %83 : vector<8x96xf32>
    %85 = vector.extract_strided_slice %80 {offsets = [0, 0], sizes = [8, 32], strides = [1, 1]} : vector<8x96xf32> to vector<8x32xf32>
    %86 = vector.extract_strided_slice %84 {offsets = [0, 0], sizes = [8, 32], strides = [1, 1]} : vector<8x96xf32> to vector<8x32xf32>
    %87 = arith.addf %85, %86 : vector<8x32xf32>
    %88 = arith.negf %87 : vector<8x32xf32>
    %89 = math.exp %88 : vector<8x32xf32>
    %cst_38 = arith.constant 1.000000e+00 : f32
    %90 = vector.broadcast %cst_38 : f32 to vector<8x32xf32>
    %91 = arith.addf %90, %89 : vector<8x32xf32>
    %92 = arith.divf %90, %91 : vector<8x32xf32>
    %93 = vector.extract_strided_slice %80 {offsets = [0, 32], sizes = [8, 32], strides = [1, 1]} : vector<8x96xf32> to vector<8x32xf32>
    %94 = vector.extract_strided_slice %84 {offsets = [0, 32], sizes = [8, 32], strides = [1, 1]} : vector<8x96xf32> to vector<8x32xf32>
    %95 = arith.addf %93, %94 : vector<8x32xf32>
    %96 = arith.negf %95 : vector<8x32xf32>
    %97 = math.exp %96 : vector<8x32xf32>
    %cst_39 = arith.constant 1.000000e+00 : f32
    %98 = vector.broadcast %cst_39 : f32 to vector<8x32xf32>
    %99 = arith.addf %98, %97 : vector<8x32xf32>
    %100 = arith.divf %98, %99 : vector<8x32xf32>
    %101 = vector.extract_strided_slice %80 {offsets = [0, 64], sizes = [8, 32], strides = [1, 1]} : vector<8x96xf32> to vector<8x32xf32>
    %102 = vector.extract_strided_slice %84 {offsets = [0, 64], sizes = [8, 32], strides = [1, 1]} : vector<8x96xf32> to vector<8x32xf32>
    %103 = arith.mulf %92, %102 : vector<8x32xf32>
    %104 = arith.addf %101, %103 : vector<8x32xf32>
    %105 = math.tanh %104 : vector<8x32xf32>
    %cst_40 = arith.constant 1.000000e+00 : f32
    %106 = vector.broadcast %cst_40 : f32 to vector<8x32xf32>
    %107 = arith.subf %106, %100 : vector<8x32xf32>
    %108 = arith.mulf %107, %105 : vector<8x32xf32>
    %109 = arith.mulf %100, %78 : vector<8x32xf32>
    %110 = arith.addf %108, %109 : vector<8x32xf32>
    %c8_41 = arith.constant 8 : index
    %c0_42 = arith.constant 0 : index
    %111 = vector.load %arg15[%c8_41, %c0_42] : memref<96x32xf32, #tpu.memory_space<vmem>>, vector<8x32xf32>
    tpu.vector_store %arg15[%c8_41, %c0_42], %110 {strides = array<i32>} : memref<96x32xf32, #tpu.memory_space<vmem>>, vector<8x32xf32>,
    %c16 = arith.constant 16 : index
    %c0_43 = arith.constant 0 : index
    %112 = vector.load %arg14[%c16, %c0_43] : memref<96x96xf32, #tpu.memory_space<vmem>>, vector<8x96xf32>
    %113 = arith.truncf %110 : vector<8x32xf32> to vector<8x32xbf16>
    %cst_44 = arith.constant dense<0.000000e+00> : vector<8x96xf32>
    %114 = tpu.matmul %113, %45, %cst_44 {dimension_numbers = #tpu.dot_dimension_numbers<[1], [0], [0], [1], [0, 0, 1, 1], [], []>} : vector<8x32xbf16>, vector<32x96xbf16>, vector<8x96xf32> -> vector<8x96xf32>
    %115 = vector.broadcast %46 : vector<1x96xf32> to vector<8x96xf32>
    %116 = arith.addf %114, %115 : vector<8x96xf32>
    %117 = vector.extract_strided_slice %112 {offsets = [0, 0], sizes = [8, 32], strides = [1, 1]} : vector<8x96xf32> to vector<8x32xf32>
    %118 = vector.extract_strided_slice %116 {offsets = [0, 0], sizes = [8, 32], strides = [1, 1]} : vector<8x96xf32> to vector<8x32xf32>
    %119 = arith.addf %117, %118 : vector<8x32xf32>
    %120 = arith.negf %119 : vector<8x32xf32>
    %121 = math.exp %120 : vector<8x32xf32>
    %cst_45 = arith.constant 1.000000e+00 : f32
    %122 = vector.broadcast %cst_45 : f32 to vector<8x32xf32>
    %123 = arith.addf %122, %121 : vector<8x32xf32>
    %124 = arith.divf %122, %123 : vector<8x32xf32>
    %125 = vector.extract_strided_slice %112 {offsets = [0, 32], sizes = [8, 32], strides = [1, 1]} : vector<8x96xf32> to vector<8x32xf32>
    %126 = vector.extract_strided_slice %116 {offsets = [0, 32], sizes = [8, 32], strides = [1, 1]} : vector<8x96xf32> to vector<8x32xf32>
    %127 = arith.addf %125, %126 : vector<8x32xf32>
    %128 = arith.negf %127 : vector<8x32xf32>
    %129 = math.exp %128 : vector<8x32xf32>
    %cst_46 = arith.constant 1.000000e+00 : f32
    %130 = vector.broadcast %cst_46 : f32 to vector<8x32xf32>
    %131 = arith.addf %130, %129 : vector<8x32xf32>
    %132 = arith.divf %130, %131 : vector<8x32xf32>
    %133 = vector.extract_strided_slice %112 {offsets = [0, 64], sizes = [8, 32], strides = [1, 1]} : vector<8x96xf32> to vector<8x32xf32>
    %134 = vector.extract_strided_slice %116 {offsets = [0, 64], sizes = [8, 32], strides = [1, 1]} : vector<8x96xf32> to vector<8x32xf32>
    %135 = arith.mulf %124, %134 : vector<8x32xf32>
    %136 = arith.addf %133, %135 : vector<8x32xf32>
    %137 = math.tanh %136 : vector<8x32xf32>
    %cst_47 = arith.constant 1.000000e+00 : f32
    %138 = vector.broadcast %cst_47 : f32 to vector<8x32xf32>
    %139 = arith.subf %138, %132 : vector<8x32xf32>
    %140 = arith.mulf %139, %137 : vector<8x32xf32>
    %141 = arith.mulf %132, %110 : vector<8x32xf32>
    %142 = arith.addf %140, %141 : vector<8x32xf32>
    %c16_48 = arith.constant 16 : index
    %c0_49 = arith.constant 0 : index
    %143 = vector.load %arg15[%c16_48, %c0_49] : memref<96x32xf32, #tpu.memory_space<vmem>>, vector<8x32xf32>
    tpu.vector_store %arg15[%c16_48, %c0_49], %142 {strides = array<i32>} : memref<96x32xf32, #tpu.memory_space<vmem>>, vector<8x32xf32>,
    %c24 = arith.constant 24 : index
    %c0_50 = arith.constant 0 : index
    %144 = vector.load %arg14[%c24, %c0_50] : memref<96x96xf32, #tpu.memory_space<vmem>>, vector<8x96xf32>
    %145 = arith.truncf %142 : vector<8x32xf32> to vector<8x32xbf16>
    %cst_51 = arith.constant dense<0.000000e+00> : vector<8x96xf32>
    %146 = tpu.matmul %145, %45, %cst_51 {dimension_numbers = #tpu.dot_dimension_numbers<[1], [0], [0], [1], [0, 0, 1, 1], [], []>} : vector<8x32xbf16>, vector<32x96xbf16>, vector<8x96xf32> -> vector<8x96xf32>
    %147 = vector.broadcast %46 : vector<1x96xf32> to vector<8x96xf32>
    %148 = arith.addf %146, %147 : vector<8x96xf32>
    %149 = vector.extract_strided_slice %144 {offsets = [0, 0], sizes = [8, 32], strides = [1, 1]} : vector<8x96xf32> to vector<8x32xf32>
    %150 = vector.extract_strided_slice %148 {offsets = [0, 0], sizes = [8, 32], strides = [1, 1]} : vector<8x96xf32> to vector<8x32xf32>
    %151 = arith.addf %149, %150 : vector<8x32xf32>
    %152 = arith.negf %151 : vector<8x32xf32>
    %153 = math.exp %152 : vector<8x32xf32>
    %cst_52 = arith.constant 1.000000e+00 : f32
    %154 = vector.broadcast %cst_52 : f32 to vector<8x32xf32>
    %155 = arith.addf %154, %153 : vector<8x32xf32>
    %156 = arith.divf %154, %155 : vector<8x32xf32>
    %157 = vector.extract_strided_slice %144 {offsets = [0, 32], sizes = [8, 32], strides = [1, 1]} : vector<8x96xf32> to vector<8x32xf32>
    %158 = vector.extract_strided_slice %148 {offsets = [0, 32], sizes = [8, 32], strides = [1, 1]} : vector<8x96xf32> to vector<8x32xf32>
    %159 = arith.addf %157, %158 : vector<8x32xf32>
    %160 = arith.negf %159 : vector<8x32xf32>
    %161 = math.exp %160 : vector<8x32xf32>
    %cst_53 = arith.constant 1.000000e+00 : f32
    %162 = vector.broadcast %cst_53 : f32 to vector<8x32xf32>
    %163 = arith.addf %162, %161 : vector<8x32xf32>
    %164 = arith.divf %162, %163 : vector<8x32xf32>
    %165 = vector.extract_strided_slice %144 {offsets = [0, 64], sizes = [8, 32], strides = [1, 1]} : vector<8x96xf32> to vector<8x32xf32>
    %166 = vector.extract_strided_slice %148 {offsets = [0, 64], sizes = [8, 32], strides = [1, 1]} : vector<8x96xf32> to vector<8x32xf32>
    %167 = arith.mulf %156, %166 : vector<8x32xf32>
    %168 = arith.addf %165, %167 : vector<8x32xf32>
    %169 = math.tanh %168 : vector<8x32xf32>
    %cst_54 = arith.constant 1.000000e+00 : f32
    %170 = vector.broadcast %cst_54 : f32 to vector<8x32xf32>
    %171 = arith.subf %170, %164 : vector<8x32xf32>
    %172 = arith.mulf %171, %169 : vector<8x32xf32>
    %173 = arith.mulf %164, %142 : vector<8x32xf32>
    %174 = arith.addf %172, %173 : vector<8x32xf32>
    %c24_55 = arith.constant 24 : index
    %c0_56 = arith.constant 0 : index
    %175 = vector.load %arg15[%c24_55, %c0_56] : memref<96x32xf32, #tpu.memory_space<vmem>>, vector<8x32xf32>
    tpu.vector_store %arg15[%c24_55, %c0_56], %174 {strides = array<i32>} : memref<96x32xf32, #tpu.memory_space<vmem>>, vector<8x32xf32>,
    %c32 = arith.constant 32 : index
    %c0_57 = arith.constant 0 : index
    %176 = vector.load %arg14[%c32, %c0_57] : memref<96x96xf32, #tpu.memory_space<vmem>>, vector<8x96xf32>
    %177 = arith.truncf %174 : vector<8x32xf32> to vector<8x32xbf16>
    %cst_58 = arith.constant dense<0.000000e+00> : vector<8x96xf32>
    %178 = tpu.matmul %177, %45, %cst_58 {dimension_numbers = #tpu.dot_dimension_numbers<[1], [0], [0], [1], [0, 0, 1, 1], [], []>} : vector<8x32xbf16>, vector<32x96xbf16>, vector<8x96xf32> -> vector<8x96xf32>
    %179 = vector.broadcast %46 : vector<1x96xf32> to vector<8x96xf32>
    %180 = arith.addf %178, %179 : vector<8x96xf32>
    %181 = vector.extract_strided_slice %176 {offsets = [0, 0], sizes = [8, 32], strides = [1, 1]} : vector<8x96xf32> to vector<8x32xf32>
    %182 = vector.extract_strided_slice %180 {offsets = [0, 0], sizes = [8, 32], strides = [1, 1]} : vector<8x96xf32> to vector<8x32xf32>
    %183 = arith.addf %181, %182 : vector<8x32xf32>
    %184 = arith.negf %183 : vector<8x32xf32>
    %185 = math.exp %184 : vector<8x32xf32>
    %cst_59 = arith.constant 1.000000e+00 : f32
    %186 = vector.broadcast %cst_59 : f32 to vector<8x32xf32>
    %187 = arith.addf %186, %185 : vector<8x32xf32>
    %188 = arith.divf %186, %187 : vector<8x32xf32>
    %189 = vector.extract_strided_slice %176 {offsets = [0, 32], sizes = [8, 32], strides = [1, 1]} : vector<8x96xf32> to vector<8x32xf32>
    %190 = vector.extract_strided_slice %180 {offsets = [0, 32], sizes = [8, 32], strides = [1, 1]} : vector<8x96xf32> to vector<8x32xf32>
    %191 = arith.addf %189, %190 : vector<8x32xf32>
    %192 = arith.negf %191 : vector<8x32xf32>
    %193 = math.exp %192 : vector<8x32xf32>
    %cst_60 = arith.constant 1.000000e+00 : f32
    %194 = vector.broadcast %cst_60 : f32 to vector<8x32xf32>
    %195 = arith.addf %194, %193 : vector<8x32xf32>
    %196 = arith.divf %194, %195 : vector<8x32xf32>
    %197 = vector.extract_strided_slice %176 {offsets = [0, 64], sizes = [8, 32], strides = [1, 1]} : vector<8x96xf32> to vector<8x32xf32>
    %198 = vector.extract_strided_slice %180 {offsets = [0, 64], sizes = [8, 32], strides = [1, 1]} : vector<8x96xf32> to vector<8x32xf32>
    %199 = arith.mulf %188, %198 : vector<8x32xf32>
    %200 = arith.addf %197, %199 : vector<8x32xf32>
    %201 = math.tanh %200 : vector<8x32xf32>
    %cst_61 = arith.constant 1.000000e+00 : f32
    %202 = vector.broadcast %cst_61 : f32 to vector<8x32xf32>
    %203 = arith.subf %202, %196 : vector<8x32xf32>
    %204 = arith.mulf %203, %201 : vector<8x32xf32>
    %205 = arith.mulf %196, %174 : vector<8x32xf32>
    %206 = arith.addf %204, %205 : vector<8x32xf32>
    %c32_62 = arith.constant 32 : index
    %c0_63 = arith.constant 0 : index
    %207 = vector.load %arg15[%c32_62, %c0_63] : memref<96x32xf32, #tpu.memory_space<vmem>>, vector<8x32xf32>
    tpu.vector_store %arg15[%c32_62, %c0_63], %206 {strides = array<i32>} : memref<96x32xf32, #tpu.memory_space<vmem>>, vector<8x32xf32>,
    %c40 = arith.constant 40 : index
    %c0_64 = arith.constant 0 : index
    %208 = vector.load %arg14[%c40, %c0_64] : memref<96x96xf32, #tpu.memory_space<vmem>>, vector<8x96xf32>
    %209 = arith.truncf %206 : vector<8x32xf32> to vector<8x32xbf16>
    %cst_65 = arith.constant dense<0.000000e+00> : vector<8x96xf32>
    %210 = tpu.matmul %209, %45, %cst_65 {dimension_numbers = #tpu.dot_dimension_numbers<[1], [0], [0], [1], [0, 0, 1, 1], [], []>} : vector<8x32xbf16>, vector<32x96xbf16>, vector<8x96xf32> -> vector<8x96xf32>
    %211 = vector.broadcast %46 : vector<1x96xf32> to vector<8x96xf32>
    %212 = arith.addf %210, %211 : vector<8x96xf32>
    %213 = vector.extract_strided_slice %208 {offsets = [0, 0], sizes = [8, 32], strides = [1, 1]} : vector<8x96xf32> to vector<8x32xf32>
    %214 = vector.extract_strided_slice %212 {offsets = [0, 0], sizes = [8, 32], strides = [1, 1]} : vector<8x96xf32> to vector<8x32xf32>
    %215 = arith.addf %213, %214 : vector<8x32xf32>
    %216 = arith.negf %215 : vector<8x32xf32>
    %217 = math.exp %216 : vector<8x32xf32>
    %cst_66 = arith.constant 1.000000e+00 : f32
    %218 = vector.broadcast %cst_66 : f32 to vector<8x32xf32>
    %219 = arith.addf %218, %217 : vector<8x32xf32>
    %220 = arith.divf %218, %219 : vector<8x32xf32>
    %221 = vector.extract_strided_slice %208 {offsets = [0, 32], sizes = [8, 32], strides = [1, 1]} : vector<8x96xf32> to vector<8x32xf32>
    %222 = vector.extract_strided_slice %212 {offsets = [0, 32], sizes = [8, 32], strides = [1, 1]} : vector<8x96xf32> to vector<8x32xf32>
    %223 = arith.addf %221, %222 : vector<8x32xf32>
    %224 = arith.negf %223 : vector<8x32xf32>
    %225 = math.exp %224 : vector<8x32xf32>
    %cst_67 = arith.constant 1.000000e+00 : f32
    %226 = vector.broadcast %cst_67 : f32 to vector<8x32xf32>
    %227 = arith.addf %226, %225 : vector<8x32xf32>
    %228 = arith.divf %226, %227 : vector<8x32xf32>
    %229 = vector.extract_strided_slice %208 {offsets = [0, 64], sizes = [8, 32], strides = [1, 1]} : vector<8x96xf32> to vector<8x32xf32>
    %230 = vector.extract_strided_slice %212 {offsets = [0, 64], sizes = [8, 32], strides = [1, 1]} : vector<8x96xf32> to vector<8x32xf32>
    %231 = arith.mulf %220, %230 : vector<8x32xf32>
    %232 = arith.addf %229, %231 : vector<8x32xf32>
    %233 = math.tanh %232 : vector<8x32xf32>
    %cst_68 = arith.constant 1.000000e+00 : f32
    %234 = vector.broadcast %cst_68 : f32 to vector<8x32xf32>
    %235 = arith.subf %234, %228 : vector<8x32xf32>
    %236 = arith.mulf %235, %233 : vector<8x32xf32>
    %237 = arith.mulf %228, %206 : vector<8x32xf32>
    %238 = arith.addf %236, %237 : vector<8x32xf32>
    %c40_69 = arith.constant 40 : index
    %c0_70 = arith.constant 0 : index
    %239 = vector.load %arg15[%c40_69, %c0_70] : memref<96x32xf32, #tpu.memory_space<vmem>>, vector<8x32xf32>
    tpu.vector_store %arg15[%c40_69, %c0_70], %238 {strides = array<i32>} : memref<96x32xf32, #tpu.memory_space<vmem>>, vector<8x32xf32>,
    %c48 = arith.constant 48 : index
    %c0_71 = arith.constant 0 : index
    %240 = vector.load %arg14[%c48, %c0_71] : memref<96x96xf32, #tpu.memory_space<vmem>>, vector<8x96xf32>
    %241 = arith.truncf %238 : vector<8x32xf32> to vector<8x32xbf16>
    %cst_72 = arith.constant dense<0.000000e+00> : vector<8x96xf32>
    %242 = tpu.matmul %241, %45, %cst_72 {dimension_numbers = #tpu.dot_dimension_numbers<[1], [0], [0], [1], [0, 0, 1, 1], [], []>} : vector<8x32xbf16>, vector<32x96xbf16>, vector<8x96xf32> -> vector<8x96xf32>
    %243 = vector.broadcast %46 : vector<1x96xf32> to vector<8x96xf32>
    %244 = arith.addf %242, %243 : vector<8x96xf32>
    %245 = vector.extract_strided_slice %240 {offsets = [0, 0], sizes = [8, 32], strides = [1, 1]} : vector<8x96xf32> to vector<8x32xf32>
    %246 = vector.extract_strided_slice %244 {offsets = [0, 0], sizes = [8, 32], strides = [1, 1]} : vector<8x96xf32> to vector<8x32xf32>
    %247 = arith.addf %245, %246 : vector<8x32xf32>
    %248 = arith.negf %247 : vector<8x32xf32>
    %249 = math.exp %248 : vector<8x32xf32>
    %cst_73 = arith.constant 1.000000e+00 : f32
    %250 = vector.broadcast %cst_73 : f32 to vector<8x32xf32>
    %251 = arith.addf %250, %249 : vector<8x32xf32>
    %252 = arith.divf %250, %251 : vector<8x32xf32>
    %253 = vector.extract_strided_slice %240 {offsets = [0, 32], sizes = [8, 32], strides = [1, 1]} : vector<8x96xf32> to vector<8x32xf32>
    %254 = vector.extract_strided_slice %244 {offsets = [0, 32], sizes = [8, 32], strides = [1, 1]} : vector<8x96xf32> to vector<8x32xf32>
    %255 = arith.addf %253, %254 : vector<8x32xf32>
    %256 = arith.negf %255 : vector<8x32xf32>
    %257 = math.exp %256 : vector<8x32xf32>
    %cst_74 = arith.constant 1.000000e+00 : f32
    %258 = vector.broadcast %cst_74 : f32 to vector<8x32xf32>
    %259 = arith.addf %258, %257 : vector<8x32xf32>
    %260 = arith.divf %258, %259 : vector<8x32xf32>
    %261 = vector.extract_strided_slice %240 {offsets = [0, 64], sizes = [8, 32], strides = [1, 1]} : vector<8x96xf32> to vector<8x32xf32>
    %262 = vector.extract_strided_slice %244 {offsets = [0, 64], sizes = [8, 32], strides = [1, 1]} : vector<8x96xf32> to vector<8x32xf32>
    %263 = arith.mulf %252, %262 : vector<8x32xf32>
    %264 = arith.addf %261, %263 : vector<8x32xf32>
    %265 = math.tanh %264 : vector<8x32xf32>
    %cst_75 = arith.constant 1.000000e+00 : f32
    %266 = vector.broadcast %cst_75 : f32 to vector<8x32xf32>
    %267 = arith.subf %266, %260 : vector<8x32xf32>
    %268 = arith.mulf %267, %265 : vector<8x32xf32>
    %269 = arith.mulf %260, %238 : vector<8x32xf32>
    %270 = arith.addf %268, %269 : vector<8x32xf32>
    %c48_76 = arith.constant 48 : index
    %c0_77 = arith.constant 0 : index
    %271 = vector.load %arg15[%c48_76, %c0_77] : memref<96x32xf32, #tpu.memory_space<vmem>>, vector<8x32xf32>
    tpu.vector_store %arg15[%c48_76, %c0_77], %270 {strides = array<i32>} : memref<96x32xf32, #tpu.memory_space<vmem>>, vector<8x32xf32>,
    %c56 = arith.constant 56 : index
    %c0_78 = arith.constant 0 : index
    %272 = vector.load %arg14[%c56, %c0_78] : memref<96x96xf32, #tpu.memory_space<vmem>>, vector<8x96xf32>
    %273 = arith.truncf %270 : vector<8x32xf32> to vector<8x32xbf16>
    %cst_79 = arith.constant dense<0.000000e+00> : vector<8x96xf32>
    %274 = tpu.matmul %273, %45, %cst_79 {dimension_numbers = #tpu.dot_dimension_numbers<[1], [0], [0], [1], [0, 0, 1, 1], [], []>} : vector<8x32xbf16>, vector<32x96xbf16>, vector<8x96xf32> -> vector<8x96xf32>
    %275 = vector.broadcast %46 : vector<1x96xf32> to vector<8x96xf32>
    %276 = arith.addf %274, %275 : vector<8x96xf32>
    %277 = vector.extract_strided_slice %272 {offsets = [0, 0], sizes = [8, 32], strides = [1, 1]} : vector<8x96xf32> to vector<8x32xf32>
    %278 = vector.extract_strided_slice %276 {offsets = [0, 0], sizes = [8, 32], strides = [1, 1]} : vector<8x96xf32> to vector<8x32xf32>
    %279 = arith.addf %277, %278 : vector<8x32xf32>
    %280 = arith.negf %279 : vector<8x32xf32>
    %281 = math.exp %280 : vector<8x32xf32>
    %cst_80 = arith.constant 1.000000e+00 : f32
    %282 = vector.broadcast %cst_80 : f32 to vector<8x32xf32>
    %283 = arith.addf %282, %281 : vector<8x32xf32>
    %284 = arith.divf %282, %283 : vector<8x32xf32>
    %285 = vector.extract_strided_slice %272 {offsets = [0, 32], sizes = [8, 32], strides = [1, 1]} : vector<8x96xf32> to vector<8x32xf32>
    %286 = vector.extract_strided_slice %276 {offsets = [0, 32], sizes = [8, 32], strides = [1, 1]} : vector<8x96xf32> to vector<8x32xf32>
    %287 = arith.addf %285, %286 : vector<8x32xf32>
    %288 = arith.negf %287 : vector<8x32xf32>
    %289 = math.exp %288 : vector<8x32xf32>
    %cst_81 = arith.constant 1.000000e+00 : f32
    %290 = vector.broadcast %cst_81 : f32 to vector<8x32xf32>
    %291 = arith.addf %290, %289 : vector<8x32xf32>
    %292 = arith.divf %290, %291 : vector<8x32xf32>
    %293 = vector.extract_strided_slice %272 {offsets = [0, 64], sizes = [8, 32], strides = [1, 1]} : vector<8x96xf32> to vector<8x32xf32>
    %294 = vector.extract_strided_slice %276 {offsets = [0, 64], sizes = [8, 32], strides = [1, 1]} : vector<8x96xf32> to vector<8x32xf32>
    %295 = arith.mulf %284, %294 : vector<8x32xf32>
    %296 = arith.addf %293, %295 : vector<8x32xf32>
    %297 = math.tanh %296 : vector<8x32xf32>
    %cst_82 = arith.constant 1.000000e+00 : f32
    %298 = vector.broadcast %cst_82 : f32 to vector<8x32xf32>
    %299 = arith.subf %298, %292 : vector<8x32xf32>
    %300 = arith.mulf %299, %297 : vector<8x32xf32>
    %301 = arith.mulf %292, %270 : vector<8x32xf32>
    %302 = arith.addf %300, %301 : vector<8x32xf32>
    %c56_83 = arith.constant 56 : index
    %c0_84 = arith.constant 0 : index
    %303 = vector.load %arg15[%c56_83, %c0_84] : memref<96x32xf32, #tpu.memory_space<vmem>>, vector<8x32xf32>
    tpu.vector_store %arg15[%c56_83, %c0_84], %302 {strides = array<i32>} : memref<96x32xf32, #tpu.memory_space<vmem>>, vector<8x32xf32>,
    %c64 = arith.constant 64 : index
    %c0_85 = arith.constant 0 : index
    %304 = vector.load %arg14[%c64, %c0_85] : memref<96x96xf32, #tpu.memory_space<vmem>>, vector<8x96xf32>
    %305 = arith.truncf %302 : vector<8x32xf32> to vector<8x32xbf16>
    %cst_86 = arith.constant dense<0.000000e+00> : vector<8x96xf32>
    %306 = tpu.matmul %305, %45, %cst_86 {dimension_numbers = #tpu.dot_dimension_numbers<[1], [0], [0], [1], [0, 0, 1, 1], [], []>} : vector<8x32xbf16>, vector<32x96xbf16>, vector<8x96xf32> -> vector<8x96xf32>
    %307 = vector.broadcast %46 : vector<1x96xf32> to vector<8x96xf32>
    %308 = arith.addf %306, %307 : vector<8x96xf32>
    %309 = vector.extract_strided_slice %304 {offsets = [0, 0], sizes = [8, 32], strides = [1, 1]} : vector<8x96xf32> to vector<8x32xf32>
    %310 = vector.extract_strided_slice %308 {offsets = [0, 0], sizes = [8, 32], strides = [1, 1]} : vector<8x96xf32> to vector<8x32xf32>
    %311 = arith.addf %309, %310 : vector<8x32xf32>
    %312 = arith.negf %311 : vector<8x32xf32>
    %313 = math.exp %312 : vector<8x32xf32>
    %cst_87 = arith.constant 1.000000e+00 : f32
    %314 = vector.broadcast %cst_87 : f32 to vector<8x32xf32>
    %315 = arith.addf %314, %313 : vector<8x32xf32>
    %316 = arith.divf %314, %315 : vector<8x32xf32>
    %317 = vector.extract_strided_slice %304 {offsets = [0, 32], sizes = [8, 32], strides = [1, 1]} : vector<8x96xf32> to vector<8x32xf32>
    %318 = vector.extract_strided_slice %308 {offsets = [0, 32], sizes = [8, 32], strides = [1, 1]} : vector<8x96xf32> to vector<8x32xf32>
    %319 = arith.addf %317, %318 : vector<8x32xf32>
    %320 = arith.negf %319 : vector<8x32xf32>
    %321 = math.exp %320 : vector<8x32xf32>
    %cst_88 = arith.constant 1.000000e+00 : f32
    %322 = vector.broadcast %cst_88 : f32 to vector<8x32xf32>
    %323 = arith.addf %322, %321 : vector<8x32xf32>
    %324 = arith.divf %322, %323 : vector<8x32xf32>
    %325 = vector.extract_strided_slice %304 {offsets = [0, 64], sizes = [8, 32], strides = [1, 1]} : vector<8x96xf32> to vector<8x32xf32>
    %326 = vector.extract_strided_slice %308 {offsets = [0, 64], sizes = [8, 32], strides = [1, 1]} : vector<8x96xf32> to vector<8x32xf32>
    %327 = arith.mulf %316, %326 : vector<8x32xf32>
    %328 = arith.addf %325, %327 : vector<8x32xf32>
    %329 = math.tanh %328 : vector<8x32xf32>
    %cst_89 = arith.constant 1.000000e+00 : f32
    %330 = vector.broadcast %cst_89 : f32 to vector<8x32xf32>
    %331 = arith.subf %330, %324 : vector<8x32xf32>
    %332 = arith.mulf %331, %329 : vector<8x32xf32>
    %333 = arith.mulf %324, %302 : vector<8x32xf32>
    %334 = arith.addf %332, %333 : vector<8x32xf32>
    %c64_90 = arith.constant 64 : index
    %c0_91 = arith.constant 0 : index
    %335 = vector.load %arg15[%c64_90, %c0_91] : memref<96x32xf32, #tpu.memory_space<vmem>>, vector<8x32xf32>
    tpu.vector_store %arg15[%c64_90, %c0_91], %334 {strides = array<i32>} : memref<96x32xf32, #tpu.memory_space<vmem>>, vector<8x32xf32>,
    %c72 = arith.constant 72 : index
    %c0_92 = arith.constant 0 : index
    %336 = vector.load %arg14[%c72, %c0_92] : memref<96x96xf32, #tpu.memory_space<vmem>>, vector<8x96xf32>
    %337 = arith.truncf %334 : vector<8x32xf32> to vector<8x32xbf16>
    %cst_93 = arith.constant dense<0.000000e+00> : vector<8x96xf32>
    %338 = tpu.matmul %337, %45, %cst_93 {dimension_numbers = #tpu.dot_dimension_numbers<[1], [0], [0], [1], [0, 0, 1, 1], [], []>} : vector<8x32xbf16>, vector<32x96xbf16>, vector<8x96xf32> -> vector<8x96xf32>
    %339 = vector.broadcast %46 : vector<1x96xf32> to vector<8x96xf32>
    %340 = arith.addf %338, %339 : vector<8x96xf32>
    %341 = vector.extract_strided_slice %336 {offsets = [0, 0], sizes = [8, 32], strides = [1, 1]} : vector<8x96xf32> to vector<8x32xf32>
    %342 = vector.extract_strided_slice %340 {offsets = [0, 0], sizes = [8, 32], strides = [1, 1]} : vector<8x96xf32> to vector<8x32xf32>
    %343 = arith.addf %341, %342 : vector<8x32xf32>
    %344 = arith.negf %343 : vector<8x32xf32>
    %345 = math.exp %344 : vector<8x32xf32>
    %cst_94 = arith.constant 1.000000e+00 : f32
    %346 = vector.broadcast %cst_94 : f32 to vector<8x32xf32>
    %347 = arith.addf %346, %345 : vector<8x32xf32>
    %348 = arith.divf %346, %347 : vector<8x32xf32>
    %349 = vector.extract_strided_slice %336 {offsets = [0, 32], sizes = [8, 32], strides = [1, 1]} : vector<8x96xf32> to vector<8x32xf32>
    %350 = vector.extract_strided_slice %340 {offsets = [0, 32], sizes = [8, 32], strides = [1, 1]} : vector<8x96xf32> to vector<8x32xf32>
    %351 = arith.addf %349, %350 : vector<8x32xf32>
    %352 = arith.negf %351 : vector<8x32xf32>
    %353 = math.exp %352 : vector<8x32xf32>
    %cst_95 = arith.constant 1.000000e+00 : f32
    %354 = vector.broadcast %cst_95 : f32 to vector<8x32xf32>
    %355 = arith.addf %354, %353 : vector<8x32xf32>
    %356 = arith.divf %354, %355 : vector<8x32xf32>
    %357 = vector.extract_strided_slice %336 {offsets = [0, 64], sizes = [8, 32], strides = [1, 1]} : vector<8x96xf32> to vector<8x32xf32>
    %358 = vector.extract_strided_slice %340 {offsets = [0, 64], sizes = [8, 32], strides = [1, 1]} : vector<8x96xf32> to vector<8x32xf32>
    %359 = arith.mulf %348, %358 : vector<8x32xf32>
    %360 = arith.addf %357, %359 : vector<8x32xf32>
    %361 = math.tanh %360 : vector<8x32xf32>
    %cst_96 = arith.constant 1.000000e+00 : f32
    %362 = vector.broadcast %cst_96 : f32 to vector<8x32xf32>
    %363 = arith.subf %362, %356 : vector<8x32xf32>
    %364 = arith.mulf %363, %361 : vector<8x32xf32>
    %365 = arith.mulf %356, %334 : vector<8x32xf32>
    %366 = arith.addf %364, %365 : vector<8x32xf32>
    %c72_97 = arith.constant 72 : index
    %c0_98 = arith.constant 0 : index
    %367 = vector.load %arg15[%c72_97, %c0_98] : memref<96x32xf32, #tpu.memory_space<vmem>>, vector<8x32xf32>
    tpu.vector_store %arg15[%c72_97, %c0_98], %366 {strides = array<i32>} : memref<96x32xf32, #tpu.memory_space<vmem>>, vector<8x32xf32>,
    %c80 = arith.constant 80 : index
    %c0_99 = arith.constant 0 : index
    %368 = vector.load %arg14[%c80, %c0_99] : memref<96x96xf32, #tpu.memory_space<vmem>>, vector<8x96xf32>
    %369 = arith.truncf %366 : vector<8x32xf32> to vector<8x32xbf16>
    %cst_100 = arith.constant dense<0.000000e+00> : vector<8x96xf32>
    %370 = tpu.matmul %369, %45, %cst_100 {dimension_numbers = #tpu.dot_dimension_numbers<[1], [0], [0], [1], [0, 0, 1, 1], [], []>} : vector<8x32xbf16>, vector<32x96xbf16>, vector<8x96xf32> -> vector<8x96xf32>
    %371 = vector.broadcast %46 : vector<1x96xf32> to vector<8x96xf32>
    %372 = arith.addf %370, %371 : vector<8x96xf32>
    %373 = vector.extract_strided_slice %368 {offsets = [0, 0], sizes = [8, 32], strides = [1, 1]} : vector<8x96xf32> to vector<8x32xf32>
    %374 = vector.extract_strided_slice %372 {offsets = [0, 0], sizes = [8, 32], strides = [1, 1]} : vector<8x96xf32> to vector<8x32xf32>
    %375 = arith.addf %373, %374 : vector<8x32xf32>
    %376 = arith.negf %375 : vector<8x32xf32>
    %377 = math.exp %376 : vector<8x32xf32>
    %cst_101 = arith.constant 1.000000e+00 : f32
    %378 = vector.broadcast %cst_101 : f32 to vector<8x32xf32>
    %379 = arith.addf %378, %377 : vector<8x32xf32>
    %380 = arith.divf %378, %379 : vector<8x32xf32>
    %381 = vector.extract_strided_slice %368 {offsets = [0, 32], sizes = [8, 32], strides = [1, 1]} : vector<8x96xf32> to vector<8x32xf32>
    %382 = vector.extract_strided_slice %372 {offsets = [0, 32], sizes = [8, 32], strides = [1, 1]} : vector<8x96xf32> to vector<8x32xf32>
    %383 = arith.addf %381, %382 : vector<8x32xf32>
    %384 = arith.negf %383 : vector<8x32xf32>
    %385 = math.exp %384 : vector<8x32xf32>
    %cst_102 = arith.constant 1.000000e+00 : f32
    %386 = vector.broadcast %cst_102 : f32 to vector<8x32xf32>
    %387 = arith.addf %386, %385 : vector<8x32xf32>
    %388 = arith.divf %386, %387 : vector<8x32xf32>
    %389 = vector.extract_strided_slice %368 {offsets = [0, 64], sizes = [8, 32], strides = [1, 1]} : vector<8x96xf32> to vector<8x32xf32>
    %390 = vector.extract_strided_slice %372 {offsets = [0, 64], sizes = [8, 32], strides = [1, 1]} : vector<8x96xf32> to vector<8x32xf32>
    %391 = arith.mulf %380, %390 : vector<8x32xf32>
    %392 = arith.addf %389, %391 : vector<8x32xf32>
    %393 = math.tanh %392 : vector<8x32xf32>
    %cst_103 = arith.constant 1.000000e+00 : f32
    %394 = vector.broadcast %cst_103 : f32 to vector<8x32xf32>
    %395 = arith.subf %394, %388 : vector<8x32xf32>
    %396 = arith.mulf %395, %393 : vector<8x32xf32>
    %397 = arith.mulf %388, %366 : vector<8x32xf32>
    %398 = arith.addf %396, %397 : vector<8x32xf32>
    %c80_104 = arith.constant 80 : index
    %c0_105 = arith.constant 0 : index
    %399 = vector.load %arg15[%c80_104, %c0_105] : memref<96x32xf32, #tpu.memory_space<vmem>>, vector<8x32xf32>
    tpu.vector_store %arg15[%c80_104, %c0_105], %398 {strides = array<i32>} : memref<96x32xf32, #tpu.memory_space<vmem>>, vector<8x32xf32>,
    %c88 = arith.constant 88 : index
    %c0_106 = arith.constant 0 : index
    %400 = vector.load %arg14[%c88, %c0_106] : memref<96x96xf32, #tpu.memory_space<vmem>>, vector<8x96xf32>
    %401 = arith.truncf %398 : vector<8x32xf32> to vector<8x32xbf16>
    %cst_107 = arith.constant dense<0.000000e+00> : vector<8x96xf32>
    %402 = tpu.matmul %401, %45, %cst_107 {dimension_numbers = #tpu.dot_dimension_numbers<[1], [0], [0], [1], [0, 0, 1, 1], [], []>} : vector<8x32xbf16>, vector<32x96xbf16>, vector<8x96xf32> -> vector<8x96xf32>
    %403 = vector.broadcast %46 : vector<1x96xf32> to vector<8x96xf32>
    %404 = arith.addf %402, %403 : vector<8x96xf32>
    %405 = vector.extract_strided_slice %400 {offsets = [0, 0], sizes = [8, 32], strides = [1, 1]} : vector<8x96xf32> to vector<8x32xf32>
    %406 = vector.extract_strided_slice %404 {offsets = [0, 0], sizes = [8, 32], strides = [1, 1]} : vector<8x96xf32> to vector<8x32xf32>
    %407 = arith.addf %405, %406 : vector<8x32xf32>
    %408 = arith.negf %407 : vector<8x32xf32>
    %409 = math.exp %408 : vector<8x32xf32>
    %cst_108 = arith.constant 1.000000e+00 : f32
    %410 = vector.broadcast %cst_108 : f32 to vector<8x32xf32>
    %411 = arith.addf %410, %409 : vector<8x32xf32>
    %412 = arith.divf %410, %411 : vector<8x32xf32>
    %413 = vector.extract_strided_slice %400 {offsets = [0, 32], sizes = [8, 32], strides = [1, 1]} : vector<8x96xf32> to vector<8x32xf32>
    %414 = vector.extract_strided_slice %404 {offsets = [0, 32], sizes = [8, 32], strides = [1, 1]} : vector<8x96xf32> to vector<8x32xf32>
    %415 = arith.addf %413, %414 : vector<8x32xf32>
    %416 = arith.negf %415 : vector<8x32xf32>
    %417 = math.exp %416 : vector<8x32xf32>
    %cst_109 = arith.constant 1.000000e+00 : f32
    %418 = vector.broadcast %cst_109 : f32 to vector<8x32xf32>
    %419 = arith.addf %418, %417 : vector<8x32xf32>
    %420 = arith.divf %418, %419 : vector<8x32xf32>
    %421 = vector.extract_strided_slice %400 {offsets = [0, 64], sizes = [8, 32], strides = [1, 1]} : vector<8x96xf32> to vector<8x32xf32>
    %422 = vector.extract_strided_slice %404 {offsets = [0, 64], sizes = [8, 32], strides = [1, 1]} : vector<8x96xf32> to vector<8x32xf32>
    %423 = arith.mulf %412, %422 : vector<8x32xf32>
    %424 = arith.addf %421, %423 : vector<8x32xf32>
    %425 = math.tanh %424 : vector<8x32xf32>
    %cst_110 = arith.constant 1.000000e+00 : f32
    %426 = vector.broadcast %cst_110 : f32 to vector<8x32xf32>
    %427 = arith.subf %426, %420 : vector<8x32xf32>
    %428 = arith.mulf %427, %425 : vector<8x32xf32>
    %429 = arith.mulf %420, %398 : vector<8x32xf32>
    %430 = arith.addf %428, %429 : vector<8x32xf32>
    %c88_111 = arith.constant 88 : index
    %c0_112 = arith.constant 0 : index
    %431 = vector.load %arg15[%c88_111, %c0_112] : memref<96x32xf32, #tpu.memory_space<vmem>>, vector<8x32xf32>
    tpu.vector_store %arg15[%c88_111, %c0_112], %430 {strides = array<i32>} : memref<96x32xf32, #tpu.memory_space<vmem>>, vector<8x32xf32>,
    %c0_113 = arith.constant 0 : index
    %c0_114 = arith.constant 0 : index
    %432 = vector.load %arg15[%c0_113, %c0_114] : memref<96x32xf32, #tpu.memory_space<vmem>>, vector<96x32xf32>
    %433 = arith.truncf %432 : vector<96x32xf32> to vector<96x32xbf16>
    %c0_115 = arith.constant 0 : index
    %c0_116 = arith.constant 0 : index
    %434 = vector.load %arg10[%c0_115, %c0_116] : memref<32x128xbf16, #tpu.memory_space<vmem>>, vector<32x128xbf16>
    %cst_117 = arith.constant dense<0.000000e+00> : vector<96x128xf32>
    %435 = tpu.matmul %433, %434, %cst_117 {dimension_numbers = #tpu.dot_dimension_numbers<[1], [0], [0], [1], [0, 0, 1, 1], [], []>} : vector<96x32xbf16>, vector<32x128xbf16>, vector<96x128xf32> -> vector<96x128xf32>
    %c0_118 = arith.constant 0 : index
    %c0_119 = arith.constant 0 : index
    %436 = vector.load %arg11[%c0_118, %c0_119] : memref<1x128xf32, #tpu.memory_space<vmem>>, vector<1x128xf32>
    %437 = vector.broadcast %436 : vector<1x128xf32> to vector<96x128xf32>
    %438 = arith.addf %435, %437 : vector<96x128xf32>
    %439 = tpu.iota {dimensions = array<i32: 1>} : vector<96x128xi32>
    %cst_120 = arith.constant 2.000000e+01 : f32
    %440 = vector.broadcast %cst_120 : f32 to vector<96x128xf32>
    %441 = arith.cmpf ogt, %438, %440 : vector<96x128xf32>
    %cst_121 = arith.constant 2.000000e+01 : f32
    %442 = vector.broadcast %cst_121 : f32 to vector<96x128xf32>
    %443 = arith.minimumf %438, %442 : vector<96x128xf32>
    %444 = math.exp %443 : vector<96x128xf32>
    %445 = math.log1p %444 : vector<96x128xf32>
    %446 = arith.select %441, %438, %445 : vector<96x128xi1>, vector<96x128xf32>
    %c0_i32 = arith.constant 0 : i32
    %447 = vector.broadcast %c0_i32 : i32 to vector<96x128xi32>
    %448 = arith.cmpi eq, %439, %447 : vector<96x128xi32>
    %cst_122 = arith.constant 2.000000e+00 : f32
    %449 = vector.broadcast %cst_122 : f32 to vector<96x128xf32>
    %450 = arith.addf %449, %446 : vector<96x128xf32>
    %c2_i32 = arith.constant 2 : i32
    %451 = vector.broadcast %c2_i32 : i32 to vector<96x128xi32>
    %452 = arith.cmpi eq, %439, %451 : vector<96x128xi32>
    %453 = arith.select %452, %446, %438 : vector<96x128xi1>, vector<96x128xf32>
    %454 = arith.select %448, %450, %453 : vector<96x128xi1>, vector<96x128xf32>
    %455 = vector.extract_strided_slice %454 {offsets = [0, 0], sizes = [8, 128], strides = [1, 1]} : vector<96x128xf32> to vector<8x128xf32>
    %c0_123 = arith.constant 0 : index
    %c0_124 = arith.constant 0 : index
    %456 = vector.load %arg12[%c0_123, %c0_124] : memref<8x1536xf32, #tpu.memory_space<vmem>>, vector<8x128xf32>
    tpu.vector_store %arg12[%c0_123, %c0_124], %455 {strides = array<i32>} : memref<8x1536xf32, #tpu.memory_space<vmem>>, vector<8x128xf32>,
    %457 = vector.extract_strided_slice %454 {offsets = [8, 0], sizes = [8, 128], strides = [1, 1]} : vector<96x128xf32> to vector<8x128xf32>
    %c0_125 = arith.constant 0 : index
    %c128 = arith.constant 128 : index
    %458 = vector.load %arg12[%c0_125, %c128] : memref<8x1536xf32, #tpu.memory_space<vmem>>, vector<8x128xf32>
    tpu.vector_store %arg12[%c0_125, %c128], %457 {strides = array<i32>} : memref<8x1536xf32, #tpu.memory_space<vmem>>, vector<8x128xf32>,
    %459 = vector.extract_strided_slice %454 {offsets = [16, 0], sizes = [8, 128], strides = [1, 1]} : vector<96x128xf32> to vector<8x128xf32>
    %c0_126 = arith.constant 0 : index
    %c256 = arith.constant 256 : index
    %460 = vector.load %arg12[%c0_126, %c256] : memref<8x1536xf32, #tpu.memory_space<vmem>>, vector<8x128xf32>
    tpu.vector_store %arg12[%c0_126, %c256], %459 {strides = array<i32>} : memref<8x1536xf32, #tpu.memory_space<vmem>>, vector<8x128xf32>,
    %461 = vector.extract_strided_slice %454 {offsets = [24, 0], sizes = [8, 128], strides = [1, 1]} : vector<96x128xf32> to vector<8x128xf32>
    %c0_127 = arith.constant 0 : index
    %c384 = arith.constant 384 : index
    %462 = vector.load %arg12[%c0_127, %c384] : memref<8x1536xf32, #tpu.memory_space<vmem>>, vector<8x128xf32>
    tpu.vector_store %arg12[%c0_127, %c384], %461 {strides = array<i32>} : memref<8x1536xf32, #tpu.memory_space<vmem>>, vector<8x128xf32>,
    %463 = vector.extract_strided_slice %454 {offsets = [32, 0], sizes = [8, 128], strides = [1, 1]} : vector<96x128xf32> to vector<8x128xf32>
    %c0_128 = arith.constant 0 : index
    %c512 = arith.constant 512 : index
    %464 = vector.load %arg12[%c0_128, %c512] : memref<8x1536xf32, #tpu.memory_space<vmem>>, vector<8x128xf32>
    tpu.vector_store %arg12[%c0_128, %c512], %463 {strides = array<i32>} : memref<8x1536xf32, #tpu.memory_space<vmem>>, vector<8x128xf32>,
    %465 = vector.extract_strided_slice %454 {offsets = [40, 0], sizes = [8, 128], strides = [1, 1]} : vector<96x128xf32> to vector<8x128xf32>
    %c0_129 = arith.constant 0 : index
    %c640 = arith.constant 640 : index
    %466 = vector.load %arg12[%c0_129, %c640] : memref<8x1536xf32, #tpu.memory_space<vmem>>, vector<8x128xf32>
    tpu.vector_store %arg12[%c0_129, %c640], %465 {strides = array<i32>} : memref<8x1536xf32, #tpu.memory_space<vmem>>, vector<8x128xf32>,
    %467 = vector.extract_strided_slice %454 {offsets = [48, 0], sizes = [8, 128], strides = [1, 1]} : vector<96x128xf32> to vector<8x128xf32>
    %c0_130 = arith.constant 0 : index
    %c768 = arith.constant 768 : index
    %468 = vector.load %arg12[%c0_130, %c768] : memref<8x1536xf32, #tpu.memory_space<vmem>>, vector<8x128xf32>
    tpu.vector_store %arg12[%c0_130, %c768], %467 {strides = array<i32>} : memref<8x1536xf32, #tpu.memory_space<vmem>>, vector<8x128xf32>,
    %469 = vector.extract_strided_slice %454 {offsets = [56, 0], sizes = [8, 128], strides = [1, 1]} : vector<96x128xf32> to vector<8x128xf32>
    %c0_131 = arith.constant 0 : index
    %c896 = arith.constant 896 : index
    %470 = vector.load %arg12[%c0_131, %c896] : memref<8x1536xf32, #tpu.memory_space<vmem>>, vector<8x128xf32>
    tpu.vector_store %arg12[%c0_131, %c896], %469 {strides = array<i32>} : memref<8x1536xf32, #tpu.memory_space<vmem>>, vector<8x128xf32>,
    %471 = vector.extract_strided_slice %454 {offsets = [64, 0], sizes = [8, 128], strides = [1, 1]} : vector<96x128xf32> to vector<8x128xf32>
    %c0_132 = arith.constant 0 : index
    %c1024 = arith.constant 1024 : index
    %472 = vector.load %arg12[%c0_132, %c1024] : memref<8x1536xf32, #tpu.memory_space<vmem>>, vector<8x128xf32>
    tpu.vector_store %arg12[%c0_132, %c1024], %471 {strides = array<i32>} : memref<8x1536xf32, #tpu.memory_space<vmem>>, vector<8x128xf32>,
    %473 = vector.extract_strided_slice %454 {offsets = [72, 0], sizes = [8, 128], strides = [1, 1]} : vector<96x128xf32> to vector<8x128xf32>
    %c0_133 = arith.constant 0 : index
    %c1152 = arith.constant 1152 : index
    %474 = vector.load %arg12[%c0_133, %c1152] : memref<8x1536xf32, #tpu.memory_space<vmem>>, vector<8x128xf32>
    tpu.vector_store %arg12[%c0_133, %c1152], %473 {strides = array<i32>} : memref<8x1536xf32, #tpu.memory_space<vmem>>, vector<8x128xf32>,
    %475 = vector.extract_strided_slice %454 {offsets = [80, 0], sizes = [8, 128], strides = [1, 1]} : vector<96x128xf32> to vector<8x128xf32>
    %c0_134 = arith.constant 0 : index
    %c1280 = arith.constant 1280 : index
    %476 = vector.load %arg12[%c0_134, %c1280] : memref<8x1536xf32, #tpu.memory_space<vmem>>, vector<8x128xf32>
    tpu.vector_store %arg12[%c0_134, %c1280], %475 {strides = array<i32>} : memref<8x1536xf32, #tpu.memory_space<vmem>>, vector<8x128xf32>,
    %477 = vector.extract_strided_slice %454 {offsets = [88, 0], sizes = [8, 128], strides = [1, 1]} : vector<96x128xf32> to vector<8x128xf32>
    %c0_135 = arith.constant 0 : index
    %c1408 = arith.constant 1408 : index
    %478 = vector.load %arg12[%c0_135, %c1408] : memref<8x1536xf32, #tpu.memory_space<vmem>>, vector<8x128xf32>
    tpu.vector_store %arg12[%c0_135, %c1408], %477 {strides = array<i32>} : memref<8x1536xf32, #tpu.memory_space<vmem>>, vector<8x128xf32>,
    return
  }
  func.func @transform_0(%arg0: i32) -> (i32, i32) {
    %c0_i32 = arith.constant 0 : i32
    %c0_i32_0 = arith.constant 0 : i32
    return %arg0, %c0_i32 : i32, i32
  }
  func.func @transform_1(%arg0: i32) -> (i32, i32, i32) {
    %c0_i32 = arith.constant 0 : i32
    %c0_i32_0 = arith.constant 0 : i32
    %c0_i32_1 = arith.constant 0 : i32
    return %c0_i32, %arg0, %c0_i32_0 : i32, i32, i32
  }
  func.func @transform_2(%arg0: i32) -> (i32, i32) {
    %c0_i32 = arith.constant 0 : i32
    %c0_i32_0 = arith.constant 0 : i32
    %c0_i32_1 = arith.constant 0 : i32
    return %c0_i32, %c0_i32_0 : i32, i32
  }
  func.func @transform_3(%arg0: i32) -> (i32, i32) {
    %c0_i32 = arith.constant 0 : i32
    %c0_i32_0 = arith.constant 0 : i32
    %c0_i32_1 = arith.constant 0 : i32
    return %c0_i32, %c0_i32_0 : i32, i32
  }
  func.func @transform_4(%arg0: i32) -> (i32, i32) {
    %c0_i32 = arith.constant 0 : i32
    %c0_i32_0 = arith.constant 0 : i32
    %c0_i32_1 = arith.constant 0 : i32
    return %c0_i32, %c0_i32_0 : i32, i32
  }
  func.func @transform_5(%arg0: i32) -> (i32, i32) {
    %c0_i32 = arith.constant 0 : i32
    %c0_i32_0 = arith.constant 0 : i32
    %c0_i32_1 = arith.constant 0 : i32
    return %c0_i32, %c0_i32_0 : i32, i32
  }
  func.func @transform_6(%arg0: i32) -> (i32, i32) {
    %c0_i32 = arith.constant 0 : i32
    %c0_i32_0 = arith.constant 0 : i32
    %c0_i32_1 = arith.constant 0 : i32
    return %c0_i32, %c0_i32_0 : i32, i32
  }
  func.func @transform_7(%arg0: i32) -> (i32, i32) {
    %c0_i32 = arith.constant 0 : i32
    %c0_i32_0 = arith.constant 0 : i32
    %c0_i32_1 = arith.constant 0 : i32
    return %c0_i32, %c0_i32_0 : i32, i32
  }
  func.func @transform_8(%arg0: i32) -> (i32, i32) {
    %c0_i32 = arith.constant 0 : i32
    %c0_i32_0 = arith.constant 0 : i32
    %c0_i32_1 = arith.constant 0 : i32
    return %c0_i32, %c0_i32_0 : i32, i32
  }
  func.func @transform_9(%arg0: i32) -> (i32, i32) {
    %c0_i32 = arith.constant 0 : i32
    %c0_i32_0 = arith.constant 0 : i32
    %c0_i32_1 = arith.constant 0 : i32
    return %c0_i32, %c0_i32_0 : i32, i32
  }
  func.func @transform_10(%arg0: i32) -> (i32, i32) {
    %c0_i32 = arith.constant 0 : i32
    %c0_i32_0 = arith.constant 0 : i32
    %c0_i32_1 = arith.constant 0 : i32
    return %c0_i32, %c0_i32_0 : i32, i32
  }
  func.func @transform_11(%arg0: i32) -> (i32, i32) {
    %c0_i32 = arith.constant 0 : i32
    %c0_i32_0 = arith.constant 0 : i32
    return %arg0, %c0_i32 : i32, i32
  }
  func.func @transform_12(%arg0: i32) -> (i32, i32) {
    %c0_i32 = arith.constant 0 : i32
    %c0_i32_0 = arith.constant 0 : i32
    return %arg0, %c0_i32 : i32, i32
  }
}

</mosaic_0001>

<bundles_post_ra>
// kernel: tpu_custom_call.1
= control target key start
LH: loop header
LB: loop body
LE: loop exit
PB: predicated region body
PF: predicated region fallthrough
CT: control target
= control target key end

     0   :  { %vm138_vm0 = vcmask 1041408   ;;  %vm139_vm1 = vcmask 1042432   ;;  %vm119_vm2 = vcmask 39936   ;;  %v2289_v5 = vmov 65535   ;;  %s2983_s0 = inlined_call_operand.vmem [shape: f32[8,16], index: 0, kind: input, shape index: {}]   ;;  %s2984_s1 = inlined_call_operand.vmem [shape: f32[12,8,5], index: 1, kind: input, shape index: {}]   ;;  %s2985_s2 = inlined_call_operand.vmem [shape: bf16[5,20], index: 2, kind: input, shape index: {}]   ;;  %s2986_s3 = inlined_call_operand.vmem [shape: f32[1,20], index: 3, kind: input, shape index: {}]   ;;  %s2987_s4 = inlined_call_operand.vmem [shape: bf16[4,96], index: 4, kind: input, shape index: {}]   ;;  %s2988_s5 = inlined_call_operand.vmem [shape: bf16[20,96], index: 5, kind: input, shape index: {}]   ;;  %s2989_s6 = inlined_call_operand.vmem [shape: bf16[32,96], index: 6, kind: input, shape index: {}]   ;;  %s2990_s7 = inlined_call_operand.vmem [shape: f32[1,96], index: 7, kind: input, shape index: {}]   ;;  %s2991_s8 = inlined_call_operand.vmem [shape: f32[1,96], index: 8, kind: input, shape index: {}]   ;;  %s2992_s9 = inlined_call_operand.vmem [shape: bf16[32,128], index: 9, kind: input, shape index: {}]   ;;  %s2993_s10 = inlined_call_operand.vmem [shape: f32[1,128], index: 10, kind: input, shape index: {}]   ;;  %s2994_s11 = inlined_call_operand.hbm [shape: f32[8,1536], index: 11, kind: output, shape index: {0}]   ;;  %s2995_s12 = inlined_call_operand.vmem [shape: f32[8,1], index: 12, kind: output, shape index: {1}]  }
   0x1   :  { %v2375_v0 = vld [vmem:[%s2983_s0] sm:$0xff]  ;;  %v94_v4 = vld [vmem:[%s2984_s1 + $0x8] sm:$0xff]  ;;  %v140_v6 = vsel %vm138_vm0, 4294967295, %v2289_v5  ;;  %s2290_s0 = smov 124   ;;  %v95_v9 = vld [vmem:[%s2984_s1 + $0x10] sm:$0xff] }
   0x2   :  { %v111_v1 = vld [vmem:[%s2985_s2] sm:$0x7]  ;;  %v43_v2 = vand.u32 2147483647, %v2375_v0  ;;  %v141_v8 = vsel %vm139_vm1, %v140_v6, 0  ;;  %v96_v10 = vld [vmem:[%s2984_s1 + $0x18] sm:$0xff] }
   0x3   :  { %v93_v3 = vld [vmem:[%s2984_s1] sm:$0xff]  ;;  %v143_v11 = vand.u32 %v141_v8, %v111_v1  ;;  %v98_v13 = vld [vmem:[%s2984_s1 + $0x28] sm:$0xff]  ;;  %v106_v14 = vpack.c.bf16 %v96_v10, %v95_v9 }
   0x4   :  { %v105_v7 = vpack.c.bf16 %v94_v4, %v93_v3  ;;  %45 = vrot.lane.b32.xlu0 %v43_v2, %s2290_s0  ;;  %v97_v12 = vld [vmem:[%s2984_s1 + $0x20] sm:$0xff] }
   0x5   :  { %1958 = vmatprep.subr.bf16.mxu0 %v143_v11  ;;  %v107_v15 = vpack.c.bf16 %v98_v13, %v97_v12 }
   0x6   :  { %1960 = vmatprep.mubr.msk.bf16.mxu0 %vm119_vm2, %v105_v7  ;;  %1959 = vmatpush3.bf16.msra.mxu0 %v143_v11 }
   0x7   :  { %18 = vsyncpa [#allocation5], 0  ;;  %v99_v16 = vld [vmem:[%s2984_s1 + $0x30] sm:$0xff]  ;;  %v100_v17 = vld [vmem:[%s2984_s1 + $0x38] sm:$0xff]  ;;  %vm48_vm3 = vcmask 64512   ;;  %v2291_v30 = vmov 0.0  }
   0x8   :  { %v101_v18 = vld [vmem:[%s2984_s1 + $0x40] sm:$0xff]  ;;  %v102_v19 = vld [vmem:[%s2984_s1 + $0x48] sm:$0xff]  ;;  %v108_v20 = vpack.c.bf16 %v100_v17, %v99_v16  ;;  %v103_v22 = vld [vmem:[%s2984_s1 + $0x50] sm:$0xff]  ;;  %vm251_vm4 = vcmask 162816   ;;  %vm2292_vm5 = vmmov 0   ;;  %v2293_v1 = vmov 0  }
   0x9   :  { %1961 = vmatmul.mubr.msk.bf16.vlgmr.msra.gmra.mxu0 %vm119_vm2, %v106_v14  ;;  %v109_v21 = vpack.c.bf16 %v102_v19, %v101_v18  ;;  %v104_v23 = vld [vmem:[%s2984_s1 + $0x58] sm:$0xff]  ;;  %v2139_v27 = vld [vmem:[%s2988_s5 + $0x8] ss:$0 sps:$4 sm:$0x33]   ;;  %v2140_v28 = vld [vmem:[%s2988_s5] sm:$0xff]   ;;  %vm55_vm6 = vcmask 7168  }
   0xa   :  { %1964 = vmatprep.mubr.msk.bf16.mxu0 %vm119_vm2, %v107_v15  ;;  %v110_v24 = vpack.c.bf16 %v104_v23, %v103_v22  ;;  %2118 = vmatprep.subr.msk.bf16.mxu0 %vm138_vm0, %v2139_v27  ;;  %v271_v29 = vsel %vm138_vm0, %v2139_v27, 0  ;;  %v1835_v32 = vld [vmem:[%s2986_s3] ss:$0 sm:$0xff]  ;;  %v2443_v53 = vld [vmem:[%s2989_s6 + $0x8] sm:$0xff]   ;;  %s2294_s21 = smov 127   ;;  %s2296_s22 = smov 125  }
   0xb   :  { %2119 = vmatprep.subr.msk.bf16.mxu1 %vm138_vm0, %v2139_v27  ;;  %1973 = vmatpush3.bf16.msra.mxu0 %v271_v29  ;;  %v2451_v59 = vld [vmem:[%s2989_s6] sm:$0xff]   ;;  %vm354_vm7 = vcmask 31744   ;;  %s2297_s24 = smov 64   ;;  %vm476_vm8 = vcmask 785408   ;;  %vm513_vm9 = vcmask 261120   ;;  %s2300_s27 = smov 120  }
   0xc   :  { %2116 = vmatpush3.bf16.msra.mxu1 %v271_v29  ;;  %1974 = vmatprep.subr.bf16.mxu0 %v2140_v28  ;;  %v232_v5 = vld [vmem:[%s2987_s4] sm:$0x3]  ;;  %s2301_s28 = smov 118   ;;  %s2302_s2 = smov 123  }
   0xd   :  { %2115 = vmatprep.subr.bf16.mxu1 %v2140_v28  ;;  %v374_v6 = vsel %vm138_vm0, %v232_v5, 0  ;;  %s2303_s29 = smov 121   ;;  %s2304_s30 = smov 119  }
   0xe   :  { %s2305_s13 = smov 117  }
   0xf   :  { %1975 = vmatpush3.bf16.msra.mxu0 %v2140_v28 }
  0x10   :  { %2117 = vmatpush3.bf16.msra.mxu1 %v2140_v28  ;;  %2120 = vmatprep.subr.msk.bf16.mxu0 %vm138_vm0, %v232_v5 }
  0x11   :  { %1965 = vmatmul.mubr.msk.bf16.gmra.mxu0 %vm119_vm2, %v108_v20  ;;  %2002 = vmatprep.subr.bf16.mxu1 %v2291_v30 }
  0x12   :  { %1968 = vmatprep.mubr.msk.bf16.mxu0 %vm119_vm2, %v109_v21  ;;  %v2507_v21 = vld [vmem:[%s2991_s8] ss:$0 sm:$0xff]  ;;  %s2299_s8 = smov 122  }
  0x19   :  { %1969 = vmatmul.mubr.msk.bf16.gmra.mxu0 %vm119_vm2, %v110_v24 }
  0x76   :  { %v46_v25 = vpop.permute.xlu0 %45 }
  0x77   :  { %v49_v26 = vsel %vm48_vm3, %v46_v25, 0.0 }
  0x78   :  { %50 = vadd.xlane.f32.xlu0 %v49_v26 }
  0xc9   :  { %v1962_v31 = vpop.f32.mrf.mxu0 }
  0xca   :  { %v188_v34 = vadd.f32 %v1962_v31, %v1835_v32 }
  0xcb   :  { %v179_v33 = vpop.f32.mrf.mxu0 }
  0xcc   :  { %v180_v36 = vadd.f32 %v1835_v32, %v179_v33  ;;  %v2514_v33 = vld [vmem:[%s2990_s7] ss:$0 sm:$0xff]  ;;  %s2298_s7 = smov 96  }
  0xcd   :  { %v1963_v35 = vpop.f32.mrf.mxu0 }
  0xce   :  { %v191_v37 = vadd.f32 %v1963_v35, %v1835_v32 }
  0xcf   :  { %v182_v38 = vpop.f32.mrf.mxu0 }
  0xd0   :  { %v183_v39 = vadd.f32 %v1835_v32, %v182_v38  ;;  %v234_v40 = vpack.c.bf16 %v191_v37, %v188_v34 }
  0xd1   :  { %v1966_v41 = vpop.f32.mrf.mxu0 }
  0xd2   :  { %v233_v42 = vpack.c.bf16 %v183_v39, %v180_v36  ;;  %v204_v44 = vadd.f32 %v1966_v41, %v1835_v32 }
  0xd3   :  { %v195_v43 = vpop.f32.mrf.mxu0 }
  0xd4   :  { %1976 = vmatprep.mubr.msk.bf16.mxu0 %vm251_vm4, %v233_v42  ;;  %v196_v46 = vadd.f32 %v1835_v32, %v195_v43 }
  0xd5   :  { %v1967_v45 = vpop.f32.mrf.mxu0  ;;  %1977 = vmatmul.mubr.msk.bf16.vlgmr.msra.gmra.mxu0 %vm251_vm4, %v234_v40 }
  0xd6   :  { %v207_v47 = vadd.f32 %v1967_v45, %v1835_v32  ;;  %1989 = vmatpush3.bf16.msra.mxu0 %v374_v6 }
  0xd7   :  { %v198_v48 = vpop.f32.mrf.mxu0  ;;  %2026 = vmatprep.subr.bf16.mxu0 %v2291_v30 }
  0xd8   :  { %v199_v49 = vadd.f32 %v1835_v32, %v198_v48  ;;  %v236_v50 = vpack.c.bf16 %v207_v47, %v204_v44 }
  0xd9   :  { %v1970_v51 = vpop.f32.mrf.mxu0 }
  0xda   :  { %v235_v52 = vpack.c.bf16 %v199_v49, %v196_v46  ;;  %v220_v55 = vadd.f32 %v1970_v51, %v1835_v32 }
  0xdb   :  { %v211_v54 = vpop.f32.mrf.mxu0 }
  0xdc   :  { %1980 = vmatprep.mubr.msk.bf16.mxu1 %vm251_vm4, %v235_v52  ;;  %v212_v57 = vadd.f32 %v1835_v32, %v211_v54 }
  0xdd   :  { %v1971_v56 = vpop.f32.mrf.mxu0  ;;  %1981 = vmatmul.mubr.msk.bf16.vlgmr.msra.gmra.mxu1 %vm251_vm4, %v236_v50 }
  0xde   :  { %v223_v58 = vadd.f32 %v1971_v56, %v1835_v32  ;;  %2003 = vmatpush3.bf16.msra.mxu1 %v2443_v53 }
  0xdf   :  { %v214_v60 = vpop.f32.mrf.mxu0  ;;  %2004 = vmatprep.subr.bf16.mxu1 %v2291_v30 }
  0xe0   :  { %v215_v61 = vadd.f32 %v1835_v32, %v214_v60  ;;  %v238_v62 = vpack.c.bf16 %v223_v58, %v220_v55 }
  0xe2   :  { %v237_v63 = vpack.c.bf16 %v215_v61, %v212_v57  ;;  %2005 = vmatpush3.bf16.msra.mxu1 %v2451_v59 }
  0xe3   :  { %2010 = vmatprep.subr.bf16.mxu1 %v2291_v30 }
  0xe4   :  { %1984 = vmatprep.mubr.msk.bf16.mxu1 %vm251_vm4, %v237_v63 }
  0xe5   :  { %1985 = vmatmul.mubr.msk.bf16.gmra.mxu1 %vm251_vm4, %v238_v62 }
  0xe6   :  { %2006 = vmatprep.mubr.msk.bf16.mxu1 %vm2292_vm5, %v2291_v30 }
  0xed   :  { %2007 = vmatmul.mubr.bf16.vlgmr.msra.gmra.mxu1 %v2293_v1 }
  0xee   :  { %2011 = vmatpush3.bf16.msra.mxu1 %v2443_v53  ;;  %2014 = vmatprep.mubr.msk.bf16.mxu1 %vm2292_vm5, %v2291_v30 }
  0xef   :  { %2012 = vmatprep.subr.bf16.mxu1 %v2291_v30 }
  0xf2   :  { %2013 = vmatpush3.bf16.msra.mxu1 %v2451_v59 }
  0xf3   :  { %2018 = vmatprep.subr.bf16.mxu1 %v2291_v30 }
 0x101   :  { %v51_v2 = vpop.xlane.xlu0 %50 }
 0x102   :  { %v53_v3 = vmul.f32 0.125, %v51_v2 }
 0x104   :  { %v54_v4 = vmax.f32 %v53_v3, 1e-05 }
 0x106   :  { %56 = vst.msk [vmem:[%s2995_s12] sm:$0xff] %vm55_vm6, %v54_v4  ;;  %2145 = vrcp.f32 %v54_v4  ;;  %s2295_s12 = smov 126  }
 0x113   :  { %v2146_v7 = vpop.eup %2145 }
 0x114   :  { %v2476_v8 = vmul.f32 %v2146_v7, %v2375_v0 }
 0x116   :  { %60 = vrot.lane.b32.xlu1 %v2476_v8, %s2294_s21 }
 0x11a   :  { %63 = vrot.lane.b32.xlu1 %v2476_v8, %s2295_s12 }
 0x11e   :  { %66 = vrot.lane.b32.xlu1 %v2476_v8, %s2296_s22 }
 0x188   :  { %v61_v9 = vpop.permute.xlu1 %60 }
 0x189   :  { %v226_v10 = vpack.c.bf16 %v61_v9, %v2476_v8 }
 0x18b   :  { %1990 = vmatprep.mubr.msk.bf16.mxu0 %vm354_vm7, %v226_v10 }
 0x18c   :  { %v64_v11 = vpop.permute.xlu1 %63 }
 0x190   :  { %v67_v12 = vpop.permute.xlu1 %66 }
 0x191   :  { %v227_v13 = vpack.c.bf16 %v67_v12, %v64_v11 }
 0x193   :  { %1991 = vmatmul.mubr.msk.bf16.vlgmr.msra.gmra.mxu0 %vm354_vm7, %v227_v13 }
 0x194   :  { %2027 = vmatpush3.bf16.msra.mxu0 %v2443_v53 }
 0x195   :  { %2028 = vmatprep.subr.bf16.mxu0 %v2291_v30  ;;  %v1978_v27 = vpop.f32.mrf.mxu0 }
 0x197   :  { %v307_v28 = vpop.f32.mrf.mxu0 }
 0x198   :  { %2029 = vmatpush3.bf16.msra.mxu0 %v2451_v59 }
 0x199   :  { %2042 = vmatprep.subr.bf16.mxu0 %v2291_v30  ;;  %v1979_v29 = vpop.f32.mrf.mxu0 }
 0x19b   :  { %v310_v31 = vpop.f32.mrf.mxu0 }
 0x19d   :  { %v2488_v0 = vpop.f32.mrf.mxu1 }
 0x19f   :  { %v2490_v14 = vpop.f32.mrf.mxu1 }
 0x1a1   :  { %v2492_v15 = vpop.f32.mrf.mxu1 }
 0x1a3   :  { %v2494_v16 = vpop.f32.mrf.mxu1 }
 0x1a5   :  { %v2496_v17 = vpop.f32.mrf.mxu1 }
 0x1a7   :  { %v2498_v18 = vpop.f32.mrf.mxu1 }
 0x1a9   :  { %v2500_v19 = vpop.f32.mrf.mxu1 }
 0x1ab   :  { %v2502_v20 = vpop.f32.mrf.mxu1 }
 0x1ad   :  { %v551_v22 = vpop.f32.mrf.mxu1 }
 0x1ae   :  { %v552_v23 = vadd.f32 %v2507_v21, %v551_v22 }
 0x1af   :  { %v2008_v24 = vpop.f32.mrf.mxu1 }
 0x1b0   :  { %565 = vrot.lane.b32.xlu1 %v552_v23, %s2297_s24 }
 0x1b1   :  { %v554_v25 = vpop.f32.mrf.mxu1 }
 0x1b3   :  { %v2009_v26 = vpop.f32.mrf.mxu1 }
 0x222   :  { %v566_v50 = vpop.permute.xlu1 %565 }
 0x253   :  { %v1992_v32 = vpop.f32.mrf.mxu0 }
 0x254   :  { %v419_v34 = vadd.f32 %v1992_v32, %v1978_v27 }
 0x255   :  { %v410_v35 = vpop.f32.mrf.mxu0 }
 0x256   :  { %v466_v36 = vadd.f32 %v2514_v33, %v419_v34  ;;  %v411_v37 = vadd.f32 %v410_v35, %v307_v28 }
 0x257   :  { %v1993_v38 = vpop.f32.mrf.mxu0 }
 0x258   :  { %479 = vst.msk [vmem:[#allocation2 + $0x10] sm:$0xff] %vm476_vm8, %v466_v36  ;;  %v464_v39 = vadd.f32 %v2514_v33, %v411_v37  ;;  %v422_v40 = vadd.f32 %v1993_v38, %v1979_v29 }
 0x259   :  { %v413_v41 = vpop.f32.mrf.mxu0 }
 0x25a   :  { %477 = vst.msk [vmem:[#allocation2] sm:$0xff] %vm476_vm8, %v464_v39  ;;  %v467_v42 = vadd.f32 %v2514_v33, %v422_v40  ;;  %v414_v43 = vadd.f32 %v413_v41, %v310_v31 }
 0x25c   :  { %480 = vst.msk [vmem:[#allocation2 + $0x18] sm:$0xff] %vm476_vm8, %v467_v42  ;;  %v465_v44 = vadd.f32 %v2514_v33, %v414_v43 }
 0x25e   :  { %478 = vst.msk [vmem:[#allocation2 + $0x8] sm:$0xff] %vm476_vm8, %v465_v44 }
 0x25f   :  { %v667_v41 = vld [vmem:[#allocation2 + $0x10] sm:$0xff] }
 0x261   :  { %v494_v45 = vld [vmem:[#allocation2] sm:$0xff] }
 0x262   :  { %v557_v46 = vadd.f32 %v552_v23, %v494_v45 }
 0x264   :  { %v1860_v47 = vmul.f32 -1.442695, %v557_v46 }
 0x265   :  { %v588_v7 = vld [vmem:[#allocation2 + $0x8] sm:$0xff] }
 0x266   :  { %2147 = vpow2.f32 %v1860_v47 }
 0x273   :  { %v2148_v48 = vpop.eup %2147 }
 0x274   :  { %v561_v49 = vadd.f32 1.0, %v2148_v48 }
 0x276   :  { %2149 = vrcp.f32 %v561_v49 }
 0x283   :  { %v2150_v51 = vpop.eup %2149 }
 0x284   :  { %v568_v52 = vmul.f32 %v2150_v51, %v566_v50  ;;  %v575_v57 = vsub.f32 1.0, %v2150_v51  ;;  %v581_v60 = vmul.f32 0.0, %v2150_v51 }
 0x286   :  { %570 = vrot.lane.b32.xlu1 %v568_v52, %s2297_s24 }
 0x2f8   :  { %v571_v54 = vpop.permute.xlu1 %570 }
 0x2f9   :  { %v573_v55 = vadd.f32 %v571_v54, %v494_v45 }
 0x2fb   :  { %2151 = vtanh.f32 %v573_v55 }
 0x308   :  { %v2152_v56 = vpop.eup %2151 }
 0x309   :  { %577 = vrot.lane.b32.xlu1 %v2152_v56, %s2298_s7 }
 0x37b   :  { %v578_v58 = vpop.permute.xlu1 %577 }
 0x37c   :  { %v580_v61 = vmul.f32 %v578_v58, %v575_v57 }
 0x37e   :  { %v2526_v62 = vadd.f32 %v581_v60, %v580_v61 }
 0x380   :  { %v589_v63 = vpack.c.bf16 %v2526_v62, %v2526_v62 }
 0x382   :  { %591 = vrot.lane.b32.xlu1 %v589_v63, %s2298_s7 }
 0x3f4   :  { %v592_v1 = vpop.permute.xlu1 %591 }
 0x3f5   :  { %2015 = vmatmul.mubr.msk.bf16.vlgmr.msra.gmra.mxu1 %vm513_vm9, %v592_v1 }
 0x3f6   :  { %2019 = vmatpush3.bf16.msra.mxu1 %v2443_v53  ;;  %2022 = vmatprep.mubr.msk.bf16.mxu1 %vm2292_vm5, %v2291_v30 }
 0x3f7   :  { %2020 = vmatprep.subr.bf16.mxu1 %v2291_v30 }
 0x3fa   :  { %2021 = vmatpush3.bf16.msra.mxu1 %v2451_v59 }
 0x3fb   :  { %2034 = vmatprep.subr.bf16.mxu1 %v2291_v30 }
 0x4b5   :  { %v630_v2 = vpop.f32.mrf.mxu1 }
 0x4b6   :  { %v631_v3 = vadd.f32 %v2507_v21, %v630_v2 }
 0x4b7   :  { %v2016_v4 = vpop.f32.mrf.mxu1 }
 0x4b8   :  { %644 = vrot.lane.b32.xlu1 %v631_v3, %s2297_s24  ;;  %v636_v9 = vadd.f32 %v631_v3, %v588_v7 }
 0x4b9   :  { %v633_v5 = vpop.f32.mrf.mxu1 }
 0x4ba   :  { %v1862_v10 = vmul.f32 -1.442695, %v636_v9 }
 0x4bb   :  { %v2017_v6 = vpop.f32.mrf.mxu1 }
 0x4bc   :  { %2153 = vpow2.f32 %v1862_v10 }
 0x4c9   :  { %v2154_v11 = vpop.eup %2153 }
 0x4ca   :  { %v640_v12 = vadd.f32 1.0, %v2154_v11 }
 0x4cc   :  { %2155 = vrcp.f32 %v640_v12 }
 0x4d9   :  { %v2156_v13 = vpop.eup %2155 }
 0x4da   :  { %v654_v27 = vsub.f32 1.0, %v2156_v13  ;;  %v660_v29 = vmul.f32 %v2156_v13, %v2526_v62 }
 0x52a   :  { %v645_v22 = vpop.permute.xlu1 %644 }
 0x52b   :  { %v647_v23 = vmul.f32 %v2156_v13, %v645_v22 }
 0x52d   :  { %649 = vrot.lane.b32.xlu1 %v647_v23, %s2297_s24 }
 0x59f   :  { %v650_v24 = vpop.permute.xlu1 %649 }
 0x5a0   :  { %v652_v25 = vadd.f32 %v650_v24, %v588_v7 }
 0x5a2   :  { %2157 = vtanh.f32 %v652_v25 }
 0x5af   :  { %v2158_v26 = vpop.eup %2157 }
 0x5b0   :  { %656 = vrot.lane.b32.xlu0 %v2158_v26, %s2298_s7 }
 0x5b4   :  { %75 = vrot.lane.b32.xlu0 %v2476_v8, %s2299_s8 }
 0x5b8   :  { %81 = vrot.lane.b32.xlu0 %v2476_v8, %s2300_s27 }
 0x5bc   :  { %87 = vrot.lane.b32.xlu0 %v2476_v8, %s2301_s28 }
 0x622   :  { %v657_v28 = vpop.permute.xlu0 %656 }
 0x623   :  { %v659_v31 = vmul.f32 %v657_v28, %v654_v27 }
 0x625   :  { %v2546_v32 = vadd.f32 %v660_v29, %v659_v31 }
 0x626   :  { %v76_v61 = vpop.permute.xlu0 %75 }
 0x627   :  { %v668_v34 = vpack.c.bf16 %v2546_v32, %v2546_v32 }
 0x629   :  { %670 = vrot.lane.b32.xlu1 %v668_v34, %s2298_s7 }
 0x62a   :  { %v82_v3 = vpop.permute.xlu0 %81 }
 0x62e   :  { %v88_v6 = vpop.permute.xlu0 %87 }
 0x69b   :  { %v671_v35 = vpop.permute.xlu1 %670 }
 0x69c   :  { %2023 = vmatmul.mubr.msk.bf16.vlgmr.msra.gmra.mxu1 %vm513_vm9, %v671_v35 }
 0x69d   :  { %2035 = vmatpush3.bf16.msra.mxu1 %v2443_v53  ;;  %2038 = vmatprep.mubr.msk.bf16.mxu1 %vm2292_vm5, %v2291_v30 }
 0x69e   :  { %2036 = vmatprep.subr.bf16.mxu1 %v2291_v30 }
 0x6a1   :  { %2037 = vmatpush3.bf16.msra.mxu1 %v2451_v59 }
 0x6a2   :  { %2050 = vmatprep.subr.bf16.mxu1 %v2291_v30 }
 0x75c   :  { %v709_v36 = vpop.f32.mrf.mxu1 }
 0x75d   :  { %v710_v37 = vadd.f32 %v2507_v21, %v709_v36 }
 0x75e   :  { %v2024_v38 = vpop.f32.mrf.mxu1 }
 0x75f   :  { %723 = vrot.lane.b32.xlu1 %v710_v37, %s2297_s24  ;;  %v715_v42 = vadd.f32 %v710_v37, %v667_v41 }
 0x760   :  { %v712_v39 = vpop.f32.mrf.mxu1 }
 0x761   :  { %v1864_v43 = vmul.f32 -1.442695, %v715_v42 }
 0x762   :  { %v2025_v40 = vpop.f32.mrf.mxu1 }
 0x763   :  { %2159 = vpow2.f32 %v1864_v43 }
 0x770   :  { %v2160_v44 = vpop.eup %2159 }
 0x771   :  { %v719_v45 = vadd.f32 1.0, %v2160_v44  ;;  %v746_v44 = vld [vmem:[#allocation2 + $0x18] sm:$0xff] }
 0x773   :  { %2161 = vrcp.f32 %v719_v45 }
 0x780   :  { %v2162_v46 = vpop.eup %2161 }
 0x781   :  { %v733_v52 = vsub.f32 1.0, %v2162_v46  ;;  %v739_v55 = vmul.f32 %v2162_v46, %v2546_v32 }
 0x7d1   :  { %v724_v47 = vpop.permute.xlu1 %723 }
 0x7d2   :  { %v726_v48 = vmul.f32 %v2162_v46, %v724_v47 }
 0x7d4   :  { %728 = vrot.lane.b32.xlu1 %v726_v48, %s2297_s24 }
 0x846   :  { %v729_v49 = vpop.permute.xlu1 %728 }
 0x847   :  { %v731_v50 = vadd.f32 %v729_v49, %v667_v41 }
 0x849   :  { %2163 = vtanh.f32 %v731_v50 }
 0x856   :  { %v2164_v51 = vpop.eup %2163 }
 0x857   :  { %735 = vrot.lane.b32.xlu1 %v2164_v51, %s2298_s7 }
 0x85b   :  { %69 = vrot.lane.b32.xlu1 %v2476_v8, %s2290_s0 }
 0x85f   :  { %72 = vrot.lane.b32.xlu1 %v2476_v8, %s2302_s2 }
 0x863   :  { %78 = vrot.lane.b32.xlu1 %v2476_v8, %s2303_s29 }
 0x867   :  { %84 = vrot.lane.b32.xlu1 %v2476_v8, %s2304_s30 }
 0x86b   :  { %90 = vrot.lane.b32.xlu1 %v2476_v8, %s2305_s13 }
 0x8c9   :  { %v736_v54 = vpop.permute.xlu1 %735 }
 0x8ca   :  { %v738_v56 = vmul.f32 %v736_v54, %v733_v52 }
 0x8cc   :  { %v2569_v57 = vadd.f32 %v739_v55, %v738_v56 }
 0x8cd   :  { %v70_v58 = vpop.permute.xlu1 %69 }
 0x8ce   :  { %v747_v60 = vpack.c.bf16 %v2569_v57, %v2569_v57 }
 0x8d0   :  { %749 = vrot.lane.b32.xlu0 %v747_v60, %s2298_s7 }
 0x8d1   :  { %v73_v63 = vpop.permute.xlu1 %72 }
 0x8d2   :  { %v228_v1 = vpack.c.bf16 %v73_v63, %v70_v58 }
 0x8d4   :  { %1994 = vmatprep.mubr.msk.bf16.mxu0 %vm354_vm7, %v228_v1 }
 0x8d5   :  { %v79_v2 = vpop.permute.xlu1 %78 }
 0x8d6   :  { %v229_v8 = vpack.c.bf16 %v79_v2, %v76_v61 }
 0x8d8   :  { %1995 = vmatmul.mubr.msk.bf16.gmra.mxu0 %vm354_vm7, %v229_v8 }
 0x8d9   :  { %v85_v4 = vpop.permute.xlu1 %84 }
 0x8da   :  { %v230_v5 = vpack.c.bf16 %v85_v4, %v82_v3 }
 0x8dc   :  { %1998 = vmatprep.mubr.msk.bf16.mxu0 %vm354_vm7, %v230_v5 }
 0x8dd   :  { %v91_v7 = vpop.permute.xlu1 %90 }
 0x8de   :  { %v231_v9 = vpack.c.bf16 %v91_v7, %v88_v6 }
 0x8e0   :  { %1999 = vmatmul.mubr.msk.bf16.gmra.mxu0 %vm354_vm7, %v231_v9 }
 0x8e1   :  { %2030 = vmatprep.mubr.msk.bf16.mxu0 %vm2292_vm5, %v2291_v30 }
 0x942   :  { %v750_v10 = vpop.permute.xlu0 %749 }
 0x943   :  { %2031 = vmatmul.mubr.msk.bf16.vlgmr.msra.gmra.mxu0 %vm513_vm9, %v750_v10 }
 0x944   :  { %2043 = vmatpush3.bf16.msra.mxu0 %v2443_v53  ;;  %2046 = vmatprep.mubr.msk.bf16.mxu0 %vm2292_vm5, %v2291_v30 }
 0x945   :  { %2044 = vmatprep.subr.bf16.mxu0 %v2291_v30 }
 0x948   :  { %2045 = vmatpush3.bf16.msra.mxu0 %v2451_v59 }
 0x949   :  { %2058 = vmatprep.subr.bf16.mxu0 %v2291_v30 }
 0x998   :  { %v1996_v11 = vpop.f32.mrf.mxu0 }
 0x999   :  { %v435_v12 = vadd.f32 %v1996_v11, %v2488_v0 }
 0x99a   :  { %v426_v13 = vpop.f32.mrf.mxu0 }
 0x99b   :  { %v470_v22 = vadd.f32 %v2514_v33, %v435_v12  ;;  %v427_v23 = vadd.f32 %v426_v13, %v2490_v14 }
 0x99c   :  { %v1997_v24 = vpop.f32.mrf.mxu0 }
 0x99d   :  { %483 = vst.msk [vmem:[#allocation2 + $0x30] sm:$0xff] %vm476_vm8, %v470_v22  ;;  %v468_v25 = vadd.f32 %v2514_v33, %v427_v23  ;;  %v438_v26 = vadd.f32 %v1997_v24, %v2492_v15 }
 0x99e   :  { %v429_v27 = vpop.f32.mrf.mxu0 }
 0x99f   :  { %481 = vst.msk [vmem:[#allocation2 + $0x20] sm:$0xff] %vm476_vm8, %v468_v25  ;;  %v471_v28 = vadd.f32 %v2514_v33, %v438_v26  ;;  %v430_v29 = vadd.f32 %v429_v27, %v2494_v16 }
 0x9a0   :  { %v2000_v0 = vpop.f32.mrf.mxu0 }
 0x9a1   :  { %484 = vst.msk [vmem:[#allocation2 + $0x38] sm:$0xff] %vm476_vm8, %v471_v28  ;;  %v469_v31 = vadd.f32 %v2514_v33, %v430_v29  ;;  %v451_v14 = vadd.f32 %v2000_v0, %v2496_v17 }
 0x9a2   :  { %v442_v34 = vpop.f32.mrf.mxu0 }
 0x9a3   :  { %482 = vst.msk [vmem:[#allocation2 + $0x28] sm:$0xff] %vm476_vm8, %v469_v31  ;;  %v474_v35 = vadd.f32 %v2514_v33, %v451_v14  ;;  %v443_v15 = vadd.f32 %v442_v34, %v2498_v18 }
 0x9a4   :  { %v2001_v36 = vpop.f32.mrf.mxu0 }
 0x9a5   :  { %487 = vst.msk [vmem:[#allocation2 + $0x50] sm:$0xff] %vm476_vm8, %v474_v35  ;;  %v472_v37 = vadd.f32 %v2514_v33, %v443_v15  ;;  %v454_v16 = vadd.f32 %v2001_v36, %v2500_v19 }
 0x9a6   :  { %v445_v38 = vpop.f32.mrf.mxu0  ;;  %v825_v5 = vld [vmem:[#allocation2 + $0x20] sm:$0xff] }
 0x9a7   :  { %485 = vst.msk [vmem:[#allocation2 + $0x40] sm:$0xff] %vm476_vm8, %v472_v37  ;;  %v475_v39 = vadd.f32 %v2514_v33, %v454_v16  ;;  %v446_v17 = vadd.f32 %v445_v38, %v2502_v20 }
 0x9a9   :  { %488 = vst.msk [vmem:[#allocation2 + $0x58] sm:$0xff] %vm476_vm8, %v475_v39  ;;  %v473_v40 = vadd.f32 %v2514_v33, %v446_v17 }
 0x9aa   :  { %v904_v37 = vld [vmem:[#allocation2 + $0x28] sm:$0xff] }
 0x9ab   :  { %486 = vst.msk [vmem:[#allocation2 + $0x48] sm:$0xff] %vm476_vm8, %v473_v40 }
 0xa03   :  { %v788_v18 = vpop.f32.mrf.mxu0 }
 0xa04   :  { %v789_v41 = vadd.f32 %v2507_v21, %v788_v18 }
 0xa05   :  { %v2032_v42 = vpop.f32.mrf.mxu0 }
 0xa06   :  { %802 = vrot.lane.b32.xlu1 %v789_v41, %s2297_s24  ;;  %v794_v45 = vadd.f32 %v789_v41, %v746_v44 }
 0xa07   :  { %v791_v19 = vpop.f32.mrf.mxu0 }
 0xa08   :  { %v1866_v46 = vmul.f32 -1.442695, %v794_v45 }
 0xa09   :  { %v2033_v43 = vpop.f32.mrf.mxu0 }
 0xa0a   :  { %2165 = vpow2.f32 %v1866_v46 }
 0xa17   :  { %v2166_v47 = vpop.eup %2165 }
 0xa18   :  { %v798_v20 = vadd.f32 1.0, %v2166_v47 }
 0xa1a   :  { %2167 = vrcp.f32 %v798_v20 }
 0xa27   :  { %v2168_v48 = vpop.eup %2167 }
 0xa28   :  { %v812_v54 = vsub.f32 1.0, %v2168_v48  ;;  %v818_v56 = vmul.f32 %v2168_v48, %v2569_v57 }
 0xa78   :  { %v803_v49 = vpop.permute.xlu1 %802 }
 0xa79   :  { %v805_v33 = vmul.f32 %v2168_v48, %v803_v49 }
 0xa7b   :  { %807 = vrot.lane.b32.xlu0 %v805_v33, %s2297_s24 }
 0xaed   :  { %v808_v50 = vpop.permute.xlu0 %807 }
 0xaee   :  { %v810_v51 = vadd.f32 %v808_v50, %v746_v44 }
 0xaf0   :  { %2169 = vtanh.f32 %v810_v51 }
 0xafd   :  { %v2170_v52 = vpop.eup %2169 }
 0xafe   :  { %814 = vrot.lane.b32.xlu1 %v2170_v52, %s2298_s7 }
 0xb70   :  { %v815_v55 = vpop.permute.xlu1 %814 }
 0xb71   :  { %v817_v58 = vmul.f32 %v815_v55, %v812_v54  ;;  %v983_v55 = vld [vmem:[#allocation2 + $0x30] sm:$0xff] }
 0xb73   :  { %v2616_v60 = vadd.f32 %v818_v56, %v817_v58 }
 0xb75   :  { %v826_v61 = vpack.c.bf16 %v2616_v60, %v2616_v60 }
 0xb77   :  { %828 = vrot.lane.b32.xlu0 %v826_v61, %s2298_s7 }
 0xbe9   :  { %v829_v63 = vpop.permute.xlu0 %828 }
 0xbea   :  { %2039 = vmatmul.mubr.msk.bf16.vlgmr.msra.gmra.mxu1 %vm513_vm9, %v829_v63 }
 0xbeb   :  { %2051 = vmatpush3.bf16.msra.mxu1 %v2443_v53  ;;  %2054 = vmatprep.mubr.msk.bf16.mxu1 %vm2292_vm5, %v2291_v30 }
 0xbec   :  { %2052 = vmatprep.subr.bf16.mxu1 %v2291_v30 }
 0xbef   :  { %2053 = vmatpush3.bf16.msra.mxu1 %v2451_v59 }
 0xbf0   :  { %2066 = vmatprep.subr.bf16.mxu1 %v2291_v30 }
 0xcaa   :  { %v867_v1 = vpop.f32.mrf.mxu1 }
 0xcab   :  { %v868_v2 = vadd.f32 %v2507_v21, %v867_v1 }
 0xcac   :  { %v2040_v8 = vpop.f32.mrf.mxu1 }
 0xcad   :  { %881 = vrot.lane.b32.xlu1 %v868_v2, %s2297_s24  ;;  %v873_v6 = vadd.f32 %v868_v2, %v825_v5 }
 0xcae   :  { %v870_v3 = vpop.f32.mrf.mxu1 }
 0xcaf   :  { %v1868_v7 = vmul.f32 -1.442695, %v873_v6 }
 0xcb0   :  { %v2041_v4 = vpop.f32.mrf.mxu1 }
 0xcb1   :  { %2171 = vpow2.f32 %v1868_v7 }
 0xcbe   :  { %v2172_v9 = vpop.eup %2171 }
 0xcbf   :  { %v877_v10 = vadd.f32 1.0, %v2172_v9 }
 0xcc1   :  { %2173 = vrcp.f32 %v877_v10 }
 0xcce   :  { %v2174_v11 = vpop.eup %2173 }
 0xccf   :  { %v891_v25 = vsub.f32 1.0, %v2174_v11  ;;  %v897_v27 = vmul.f32 %v2174_v11, %v2616_v60 }
 0xd1f   :  { %v882_v12 = vpop.permute.xlu1 %881 }
 0xd20   :  { %v884_v13 = vmul.f32 %v2174_v11, %v882_v12 }
 0xd22   :  { %886 = vrot.lane.b32.xlu0 %v884_v13, %s2297_s24 }
 0xd94   :  { %v887_v22 = vpop.permute.xlu0 %886 }
 0xd95   :  { %v889_v23 = vadd.f32 %v887_v22, %v825_v5 }
 0xd97   :  { %2175 = vtanh.f32 %v889_v23 }
 0xda4   :  { %v2176_v24 = vpop.eup %2175 }
 0xda5   :  { %893 = vrot.lane.b32.xlu1 %v2176_v24, %s2298_s7 }
 0xe17   :  { %v894_v26 = vpop.permute.xlu1 %893 }
 0xe18   :  { %v896_v28 = vmul.f32 %v894_v26, %v891_v25 }
 0xe1a   :  { %v2633_v29 = vadd.f32 %v897_v27, %v896_v28  ;;  %v1062_v27 = vld [vmem:[#allocation2 + $0x38] sm:$0xff] }
 0xe1c   :  { %v905_v0 = vpack.c.bf16 %v2633_v29, %v2633_v29 }
 0xe1e   :  { %907 = vrot.lane.b32.xlu0 %v905_v0, %s2298_s7 }
 0xe90   :  { %v908_v31 = vpop.permute.xlu0 %907 }
 0xe91   :  { %2047 = vmatmul.mubr.msk.bf16.vlgmr.msra.gmra.mxu0 %vm513_vm9, %v908_v31 }
 0xe92   :  { %2059 = vmatpush3.bf16.msra.mxu0 %v2443_v53  ;;  %2062 = vmatprep.mubr.msk.bf16.mxu0 %vm2292_vm5, %v2291_v30 }
 0xe93   :  { %2060 = vmatprep.subr.bf16.mxu0 %v2291_v30 }
 0xe96   :  { %2061 = vmatpush3.bf16.msra.mxu0 %v2451_v59 }
 0xe97   :  { %2074 = vmatprep.subr.bf16.mxu0 %v2291_v30 }
 0xf51   :  { %v946_v14 = vpop.f32.mrf.mxu0 }
 0xf52   :  { %v947_v34 = vadd.f32 %v2507_v21, %v946_v14 }
 0xf53   :  { %v2048_v35 = vpop.f32.mrf.mxu0 }
 0xf54   :  { %960 = vrot.lane.b32.xlu1 %v947_v34, %s2297_s24  ;;  %v952_v16 = vadd.f32 %v947_v34, %v904_v37 }
 0xf55   :  { %v949_v15 = vpop.f32.mrf.mxu0 }
 0xf56   :  { %v1870_v38 = vmul.f32 -1.442695, %v952_v16 }
 0xf57   :  { %v2049_v36 = vpop.f32.mrf.mxu0 }
 0xf58   :  { %2177 = vpow2.f32 %v1870_v38 }
 0xf65   :  { %v2178_v39 = vpop.eup %2177 }
 0xf66   :  { %v956_v17 = vadd.f32 1.0, %v2178_v39 }
 0xf68   :  { %2179 = vrcp.f32 %v956_v17 }
 0xf75   :  { %v2180_v40 = vpop.eup %2179 }
 0xf76   :  { %v970_v44 = vsub.f32 1.0, %v2180_v40  ;;  %v976_v46 = vmul.f32 %v2180_v40, %v2633_v29 }
 0xfc6   :  { %v961_v18 = vpop.permute.xlu1 %960 }
 0xfc7   :  { %v963_v41 = vmul.f32 %v2180_v40, %v961_v18 }
 0xfc9   :  { %965 = vrot.lane.b32.xlu0 %v963_v41, %s2297_s24 }
0x103b   :  { %v966_v42 = vpop.permute.xlu0 %965 }
0x103c   :  { %v968_v19 = vadd.f32 %v966_v42, %v904_v37 }
0x103e   :  { %2181 = vtanh.f32 %v968_v19 }
0x104b   :  { %v2182_v43 = vpop.eup %2181 }
0x104c   :  { %972 = vrot.lane.b32.xlu1 %v2182_v43, %s2298_s7 }
0x10be   :  { %v973_v45 = vpop.permute.xlu1 %972 }
0x10bf   :  { %v975_v47 = vmul.f32 %v973_v45, %v970_v44 }
0x10c1   :  { %v2650_v20 = vadd.f32 %v976_v46, %v975_v47  ;;  %v1141_v47 = vld [vmem:[#allocation2 + $0x40] sm:$0xff] }
0x10c3   :  { %v984_v48 = vpack.c.bf16 %v2650_v20, %v2650_v20 }
0x10c5   :  { %986 = vrot.lane.b32.xlu0 %v984_v48, %s2298_s7 }
0x1137   :  { %v987_v49 = vpop.permute.xlu0 %986 }
0x1138   :  { %2055 = vmatmul.mubr.msk.bf16.vlgmr.msra.gmra.mxu1 %vm513_vm9, %v987_v49 }
0x1139   :  { %2067 = vmatpush3.bf16.msra.mxu1 %v2443_v53  ;;  %2070 = vmatprep.mubr.msk.bf16.mxu1 %vm2292_vm5, %v2291_v30 }
0x113a   :  { %2068 = vmatprep.subr.bf16.mxu1 %v2291_v30 }
0x113d   :  { %2069 = vmatpush3.bf16.msra.mxu1 %v2451_v59 }
0x113e   :  { %2082 = vmatprep.subr.bf16.mxu1 %v2291_v30 }
0x11f8   :  { %v1025_v33 = vpop.f32.mrf.mxu1 }
0x11f9   :  { %v1026_v50 = vadd.f32 %v2507_v21, %v1025_v33 }
0x11fa   :  { %v2056_v51 = vpop.f32.mrf.mxu1 }
0x11fb   :  { %1039 = vrot.lane.b32.xlu1 %v1026_v50, %s2297_s24  ;;  %v1031_v56 = vadd.f32 %v1026_v50, %v983_v55 }
0x11fc   :  { %v1028_v52 = vpop.f32.mrf.mxu1 }
0x11fd   :  { %v1872_v58 = vmul.f32 -1.442695, %v1031_v56 }
0x11fe   :  { %v2057_v54 = vpop.f32.mrf.mxu1 }
0x11ff   :  { %2183 = vpow2.f32 %v1872_v58 }
0x120c   :  { %v2184_v61 = vpop.eup %2183 }
0x120d   :  { %v1035_v63 = vadd.f32 1.0, %v2184_v61 }
0x120f   :  { %2185 = vrcp.f32 %v1035_v63 }
0x121c   :  { %v2186_v1 = vpop.eup %2185 }
0x121d   :  { %v1049_v6 = vsub.f32 1.0, %v2186_v1  ;;  %v1055_v9 = vmul.f32 %v2186_v1, %v2650_v20 }
0x126d   :  { %v1040_v2 = vpop.permute.xlu1 %1039 }
0x126e   :  { %v1042_v8 = vmul.f32 %v2186_v1, %v1040_v2 }
0x1270   :  { %1044 = vrot.lane.b32.xlu0 %v1042_v8, %s2297_s24 }
0x12e2   :  { %v1045_v3 = vpop.permute.xlu0 %1044 }
0x12e3   :  { %v1047_v4 = vadd.f32 %v1045_v3, %v983_v55 }
0x12e5   :  { %2187 = vtanh.f32 %v1047_v4 }
0x12f2   :  { %v2188_v5 = vpop.eup %2187 }
0x12f3   :  { %1051 = vrot.lane.b32.xlu1 %v2188_v5, %s2298_s7 }
0x1365   :  { %v1052_v7 = vpop.permute.xlu1 %1051 }
0x1366   :  { %v1054_v10 = vmul.f32 %v1052_v7, %v1049_v6 }
0x1368   :  { %v2667_v11 = vadd.f32 %v1055_v9, %v1054_v10 }
0x136a   :  { %v1063_v12 = vpack.c.bf16 %v2667_v11, %v2667_v11 }
0x136c   :  { %1065 = vrot.lane.b32.xlu0 %v1063_v12, %s2298_s7  ;;  %v1220_v12 = vld [vmem:[#allocation2 + $0x48] sm:$0xff] }
0x13de   :  { %v1066_v13 = vpop.permute.xlu0 %1065 }
0x13df   :  { %2063 = vmatmul.mubr.msk.bf16.vlgmr.msra.gmra.mxu0 %vm513_vm9, %v1066_v13 }
0x13e0   :  { %2075 = vmatpush3.bf16.msra.mxu0 %v2443_v53  ;;  %2078 = vmatprep.mubr.msk.bf16.mxu0 %vm2292_vm5, %v2291_v30 }
0x13e1   :  { %2076 = vmatprep.subr.bf16.mxu0 %v2291_v30 }
0x13e4   :  { %2077 = vmatpush3.bf16.msra.mxu0 %v2451_v59 }
0x13e5   :  { %2090 = vmatprep.subr.bf16.mxu0 %v2291_v30 }
0x149f   :  { %v1104_v22 = vpop.f32.mrf.mxu0 }
0x14a0   :  { %v1105_v23 = vadd.f32 %v2507_v21, %v1104_v22 }
0x14a1   :  { %v2064_v24 = vpop.f32.mrf.mxu0 }
0x14a2   :  { %1118 = vrot.lane.b32.xlu1 %v1105_v23, %s2297_s24  ;;  %v1110_v28 = vadd.f32 %v1105_v23, %v1062_v27 }
0x14a3   :  { %v1107_v25 = vpop.f32.mrf.mxu0 }
0x14a4   :  { %v1874_v0 = vmul.f32 -1.442695, %v1110_v28 }
0x14a5   :  { %v2065_v26 = vpop.f32.mrf.mxu0 }
0x14a6   :  { %2189 = vpow2.f32 %v1874_v0 }
0x14b3   :  { %v2190_v31 = vpop.eup %2189 }
0x14b4   :  { %v1114_v14 = vadd.f32 1.0, %v2190_v31 }
0x14b6   :  { %2191 = vrcp.f32 %v1114_v14 }
0x14c3   :  { %v2192_v34 = vpop.eup %2191 }
0x14c4   :  { %v1128_v38 = vsub.f32 1.0, %v2192_v34  ;;  %v1134_v17 = vmul.f32 %v2192_v34, %v2667_v11 }
0x1514   :  { %v1119_v35 = vpop.permute.xlu1 %1118 }
0x1515   :  { %v1121_v15 = vmul.f32 %v2192_v34, %v1119_v35 }
0x1517   :  { %1123 = vrot.lane.b32.xlu0 %v1121_v15, %s2297_s24 }
0x1589   :  { %v1124_v36 = vpop.permute.xlu0 %1123 }
0x158a   :  { %v1126_v37 = vadd.f32 %v1124_v36, %v1062_v27 }
0x158c   :  { %2193 = vtanh.f32 %v1126_v37 }
0x1599   :  { %v2194_v16 = vpop.eup %2193 }
0x159a   :  { %1130 = vrot.lane.b32.xlu1 %v2194_v16, %s2298_s7 }
0x160c   :  { %v1131_v39 = vpop.permute.xlu1 %1130 }
0x160d   :  { %v1133_v40 = vmul.f32 %v1131_v39, %v1128_v38 }
0x160f   :  { %v2684_v18 = vadd.f32 %v1134_v17, %v1133_v40  ;;  %v1299_v17 = vld [vmem:[#allocation2 + $0x50] sm:$0xff] }
0x1611   :  { %v1142_v41 = vpack.c.bf16 %v2684_v18, %v2684_v18 }
0x1613   :  { %1144 = vrot.lane.b32.xlu0 %v1142_v41, %s2298_s7 }
0x1685   :  { %v1145_v42 = vpop.permute.xlu0 %1144 }
0x1686   :  { %2071 = vmatmul.mubr.msk.bf16.vlgmr.msra.gmra.mxu1 %vm513_vm9, %v1145_v42 }
0x1687   :  { %2083 = vmatpush3.bf16.msra.mxu1 %v2443_v53  ;;  %2086 = vmatprep.mubr.msk.bf16.mxu1 %vm2292_vm5, %v2291_v30 }
0x1688   :  { %2084 = vmatprep.subr.bf16.mxu1 %v2291_v30 }
0x168b   :  { %2085 = vmatpush3.bf16.msra.mxu1 %v2451_v59 }
0x1746   :  { %v1183_v19 = vpop.f32.mrf.mxu1 }
0x1747   :  { %v1184_v43 = vadd.f32 %v2507_v21, %v1183_v19 }
0x1748   :  { %v2072_v44 = vpop.f32.mrf.mxu1 }
0x1749   :  { %1197 = vrot.lane.b32.xlu1 %v1184_v43, %s2297_s24  ;;  %v1189_v48 = vadd.f32 %v1184_v43, %v1141_v47 }
0x174a   :  { %v1186_v45 = vpop.f32.mrf.mxu1 }
0x174b   :  { %v1876_v49 = vmul.f32 -1.442695, %v1189_v48 }
0x174c   :  { %v2073_v46 = vpop.f32.mrf.mxu1 }
0x174d   :  { %2195 = vpow2.f32 %v1876_v49 }
0x175a   :  { %v2196_v33 = vpop.eup %2195 }
0x175b   :  { %v1193_v50 = vadd.f32 1.0, %v2196_v33 }
0x175d   :  { %2197 = vrcp.f32 %v1193_v50 }
0x176a   :  { %v2198_v51 = vpop.eup %2197 }
0x176b   :  { %v1207_v61 = vsub.f32 1.0, %v2198_v51  ;;  %v1213_v1 = vmul.f32 %v2198_v51, %v2684_v18 }
0x17bb   :  { %v1198_v52 = vpop.permute.xlu1 %1197 }
0x17bc   :  { %v1200_v54 = vmul.f32 %v2198_v51, %v1198_v52 }
0x17be   :  { %1202 = vrot.lane.b32.xlu0 %v1200_v54, %s2297_s24 }
0x1830   :  { %v1203_v55 = vpop.permute.xlu0 %1202 }
0x1831   :  { %v1205_v56 = vadd.f32 %v1203_v55, %v1141_v47 }
0x1833   :  { %2199 = vtanh.f32 %v1205_v56 }
0x1840   :  { %v2200_v58 = vpop.eup %2199 }
0x1841   :  { %1209 = vrot.lane.b32.xlu1 %v2200_v58, %s2298_s7 }
0x18b3   :  { %v1210_v63 = vpop.permute.xlu1 %1209 }
0x18b4   :  { %v1212_v2 = vmul.f32 %v1210_v63, %v1207_v61 }
0x18b6   :  { %v2700_v8 = vadd.f32 %v1213_v1, %v1212_v2  ;;  %v1378_v2 = vld [vmem:[#allocation2 + $0x58] sm:$0xff] }
0x18b8   :  { %v1221_v3 = vpack.c.bf16 %v2700_v8, %v2700_v8 }
0x18ba   :  { %1223 = vrot.lane.b32.xlu0 %v1221_v3, %s2298_s7 }
0x192c   :  { %v1224_v4 = vpop.permute.xlu0 %1223 }
0x192d   :  { %2079 = vmatmul.mubr.msk.bf16.vlgmr.msra.gmra.mxu0 %vm513_vm9, %v1224_v4 }
0x192e   :  { %2091 = vmatpush3.bf16.msra.mxu0 %v2443_v53  ;;  %2094 = vmatprep.mubr.msk.bf16.mxu0 %vm2292_vm5, %v2291_v30 }
0x192f   :  { %2092 = vmatprep.subr.bf16.mxu0 %v2291_v30 }
0x1932   :  { %2093 = vmatpush3.bf16.msra.mxu0 %v2451_v59 }
0x19ed   :  { %v1262_v5 = vpop.f32.mrf.mxu0 }
0x19ee   :  { %v1263_v6 = vadd.f32 %v2507_v21, %v1262_v5 }
0x19ef   :  { %v2080_v7 = vpop.f32.mrf.mxu0 }
0x19f0   :  { %1276 = vrot.lane.b32.xlu1 %v1263_v6, %s2297_s24  ;;  %v1268_v13 = vadd.f32 %v1263_v6, %v1220_v12 }
0x19f1   :  { %v1265_v9 = vpop.f32.mrf.mxu0 }
0x19f2   :  { %v1878_v22 = vmul.f32 -1.442695, %v1268_v13 }
0x19f3   :  { %v2081_v10 = vpop.f32.mrf.mxu0 }
0x19f4   :  { %2201 = vpow2.f32 %v1878_v22  ;;  %v2144_v22 = vld [vmem:[%s2992_s9] sm:$0xff]  }
0x1a01   :  { %v2202_v53 = vpop.eup %2201 }
0x1a02   :  { %v1272_v23 = vadd.f32 1.0, %v2202_v53 }
0x1a04   :  { %2203 = vrcp.f32 %v1272_v23 }
0x1a11   :  { %v2204_v24 = vpop.eup %2203 }
0x1a12   :  { %v1286_v28 = vsub.f32 1.0, %v2204_v24  ;;  %v1292_v31 = vmul.f32 %v2204_v24, %v2700_v8 }
0x1a62   :  { %v1277_v25 = vpop.permute.xlu1 %1276 }
0x1a63   :  { %v1279_v30 = vmul.f32 %v2204_v24, %v1277_v25 }
0x1a65   :  { %1281 = vrot.lane.b32.xlu0 %v1279_v30, %s2297_s24 }
0x1ad7   :  { %v1282_v59 = vpop.permute.xlu0 %1281 }
0x1ad8   :  { %v1284_v26 = vadd.f32 %v1282_v59, %v1220_v12 }
0x1ada   :  { %2205 = vtanh.f32 %v1284_v26 }
0x1ae7   :  { %v2206_v27 = vpop.eup %2205 }
0x1ae8   :  { %1288 = vrot.lane.b32.xlu1 %v2206_v27, %s2298_s7 }
0x1b5a   :  { %v1289_v0 = vpop.permute.xlu1 %1288 }
0x1b5b   :  { %v1291_v14 = vmul.f32 %v1289_v0, %v1286_v28 }
0x1b5d   :  { %v2716_v34 = vadd.f32 %v1292_v31, %v1291_v14 }
0x1b5f   :  { %v1300_v35 = vpack.c.bf16 %v2716_v34, %v2716_v34 }
0x1b61   :  { %1302 = vrot.lane.b32.xlu0 %v1300_v35, %s2298_s7 }
0x1bd3   :  { %v1303_v15 = vpop.permute.xlu0 %1302 }
0x1bd4   :  { %2087 = vmatmul.mubr.msk.bf16.vlgmr.msra.gmra.mxu1 %vm513_vm9, %v1303_v15 }
0x1c94   :  { %v1341_v36 = vpop.f32.mrf.mxu1 }
0x1c95   :  { %v1342_v37 = vadd.f32 %v2507_v21, %v1341_v36 }
0x1c96   :  { %v2088_v16 = vpop.f32.mrf.mxu1 }
0x1c97   :  { %1355 = vrot.lane.b32.xlu1 %v1342_v37, %s2297_s24  ;;  %v1347_v40 = vadd.f32 %v1342_v37, %v1299_v17 }
0x1c98   :  { %v1344_v38 = vpop.f32.mrf.mxu1 }
0x1c99   :  { %v1880_v41 = vmul.f32 -1.442695, %v1347_v40 }
0x1c9a   :  { %v2089_v39 = vpop.f32.mrf.mxu1 }
0x1c9b   :  { %2207 = vpow2.f32 %v1880_v41 }
0x1ca8   :  { %v2208_v42 = vpop.eup %2207 }
0x1ca9   :  { %v1351_v19 = vadd.f32 1.0, %v2208_v42 }
0x1cab   :  { %2209 = vrcp.f32 %v1351_v19 }
0x1cb8   :  { %v2210_v43 = vpop.eup %2209 }
0x1cb9   :  { %v1365_v49 = vsub.f32 1.0, %v2210_v43  ;;  %v1371_v50 = vmul.f32 %v2210_v43, %v2716_v34 }
0x1d09   :  { %v1356_v44 = vpop.permute.xlu1 %1355 }
0x1d0a   :  { %v1358_v45 = vmul.f32 %v2210_v43, %v1356_v44 }
0x1d0c   :  { %1360 = vrot.lane.b32.xlu0 %v1358_v45, %s2297_s24  ;;  %v2782_v45 = vld [vmem:[%s2993_s10] ss:$0 sm:$0xff]  ;;  %s2306_s10 = smov [#allocation4]  }
0x1d0d   :  { %s1823_s5 = sshll.u32 %s2306_s10, 4  ;;  %s1824_s5 = int_to_ptr.vmem [resolvable:$true] %s1823_s5 }
0x1d0e   :  { %s2267_s16 = scalar_lea.vmem %s1824_s5, 1536  ;;  %p2272_p1 = scmp.lt.s32.totalorder %s1824_s5, %s1824_s5 }
0x1d0f   :  { %p2268_p0 = scmp.ne.s32.totalorder %s1824_s5, %s2267_s16  ;;  %p2273_p2 = scmp.lt.s32.totalorder %s2267_s16, %s2267_s16 }
0x1d11   :  { %p2274_p3 = por %p2273_p2, %p2272_p1 }
0x1d13   :  { %p2275_p4 = pnand %p2274_p3, %p2268_p0 }
0x1d7e   :  { %v1361_v46 = vpop.permute.xlu0 %1360 }
0x1d7f   :  { %v1363_v47 = vadd.f32 %v1361_v46, %v1299_v17 }
0x1d81   :  { %2211 = vtanh.f32 %v1363_v47 }
0x1d8e   :  { %v2212_v48 = vpop.eup %2211 }
0x1d8f   :  { %1367 = vrot.lane.b32.xlu1 %v2212_v48, %s2298_s7 }
0x1e01   :  { %v1368_v33 = vpop.permute.xlu1 %1367 }
0x1e02   :  { %v1370_v51 = vmul.f32 %v1368_v33, %v1365_v49 }
0x1e04   :  { %v1372_v52 = vadd.f32 %v1371_v50, %v1370_v51 }
0x1e06   :  { %v1379_v54 = vpack.c.bf16 %v1372_v52, %v1372_v52 }
0x1e08   :  { %1381 = vrot.lane.b32.xlu0 %v1379_v54, %s2298_s7 }
0x1e7a   :  { %v1382_v55 = vpop.permute.xlu0 %1381 }
0x1e7b   :  { %2095 = vmatmul.mubr.msk.bf16.vlgmr.msra.gmra.mxu0 %vm513_vm9, %v1382_v55 }
0x1f3b   :  { %v1420_v56 = vpop.f32.mrf.mxu0 }
0x1f3c   :  { %v1421_v58 = vadd.f32 %v2507_v21, %v1420_v56 }
0x1f3d   :  { %v2096_v61 = vpop.f32.mrf.mxu0 }
0x1f3e   :  { %1434 = vrot.lane.b32.xlu1 %v1421_v58, %s2297_s24  ;;  %v1426_v3 = vadd.f32 %v1421_v58, %v1378_v2 }
0x1f3f   :  { %v1423_v63 = vpop.f32.mrf.mxu0 }
0x1f40   :  { %v1882_v4 = vmul.f32 -1.442695, %v1426_v3 }
0x1f41   :  { %v2097_v1 = vpop.f32.mrf.mxu0 }
0x1f42   :  { %2213 = vpow2.f32 %v1882_v4 }
0x1f4f   :  { %v2214_v5 = vpop.eup %2213 }
0x1f50   :  { %v1430_v6 = vadd.f32 1.0, %v2214_v5 }
0x1f52   :  { %2215 = vrcp.f32 %v1430_v6 }
0x1f5f   :  { %v2216_v7 = vpop.eup %2215 }
0x1f60   :  { %v1444_v24 = vsub.f32 1.0, %v2216_v7  ;;  %v1450_v30 = vmul.f32 %v2216_v7, %v1372_v52 }
0x1fb0   :  { %v1435_v9 = vpop.permute.xlu1 %1434 }
0x1fb1   :  { %v1437_v10 = vmul.f32 %v2216_v7, %v1435_v9 }
0x1fb3   :  { %1439 = vrot.lane.b32.xlu0 %v1437_v10, %s2297_s24 }
0x1fb7   :  { %584 = vrot.lane.b32.xlu0 %v2526_v62, %s2298_s7 }
0x1fbb   :  { %742 = vrot.lane.b32.xlu0 %v2569_v57, %s2298_s7 }
0x1fbf   :  { %900 = vrot.lane.b32.xlu0 %v2633_v29, %s2298_s7  ;;  %v2143_v29 = vld [vmem:[%s2992_s9 + $0x8] sm:$0xff]  }
0x1fc0   :  { %2098 = vmatprep.subr.bf16.mxu1 %v2143_v29 }
0x1fc1   :  { %2099 = vmatpush3.bf16.msra.mxu1 %v2143_v29 }
0x1fc2   :  { %2100 = vmatprep.subr.bf16.mxu1 %v2144_v22 }
0x1fc3   :  { %1058 = vrot.lane.b32.xlu0 %v2667_v11, %s2298_s7 }
0x1fc5   :  { %2101 = vmatpush3.bf16.msra.mxu1 %v2144_v22 }
0x1fc7   :  { %1216 = vrot.lane.b32.xlu0 %v2700_v8, %s2298_s7 }
0x1fcb   :  { %1374 = vrot.lane.b32.xlu0 %v1372_v52, %s2298_s7 }
0x2025   :  { %v1440_v21 = vpop.permute.xlu0 %1439 }
0x2026   :  { %v1442_v12 = vadd.f32 %v1440_v21, %v1378_v2 }
0x2028   :  { %2217 = vtanh.f32 %v1442_v12 }
0x2029   :  { %v585_v13 = vpop.permute.xlu0 %584 }
0x202a   :  { %587 = vst.msk [vmem:[#allocation3] sm:$0xff] %vm513_vm9, %v585_v13 }
0x202d   :  { %v743_v62 = vpop.permute.xlu0 %742 }
0x202e   :  { %745 = vst.msk [vmem:[#allocation3 + $0x10] sm:$0xff] %vm513_vm9, %v743_v62 }
0x2031   :  { %v901_v57 = vpop.permute.xlu0 %900  ;;  %v1457_v27 = vld [vmem:[#allocation3] sm:$0xff] }
0x2032   :  { %903 = vst.msk [vmem:[#allocation3 + $0x20] sm:$0xff] %vm513_vm9, %v901_v57 }
0x2035   :  { %v2218_v11 = vpop.eup %2217  ;;  %v1059_v8 = vpop.permute.xlu0 %1058  ;;  %v1459_v31 = vld [vmem:[#allocation3 + $0x10] sm:$0xff] }
0x2036   :  { %1061 = vst.msk [vmem:[#allocation3 + $0x30] sm:$0xff] %vm513_vm9, %v1059_v8  ;;  %1446 = vrot.lane.b32.xlu1 %v2218_v11, %s2298_s7 }
0x2039   :  { %v1217_v53 = vpop.permute.xlu0 %1216  ;;  %v1461_v15 = vld [vmem:[#allocation3 + $0x20] sm:$0xff] }
0x203a   :  { %1219 = vst.msk [vmem:[#allocation3 + $0x40] sm:$0xff] %vm513_vm9, %v1217_v53  ;;  %663 = vrot.lane.b32.xlu1 %v2546_v32, %s2298_s7 }
0x203d   :  { %v1375_v23 = vpop.permute.xlu0 %1374  ;;  %v1463_v16 = vld [vmem:[#allocation3 + $0x30] sm:$0xff] }
0x203e   :  { %1377 = vst.msk [vmem:[#allocation3 + $0x50] sm:$0xff] %vm513_vm9, %v1375_v23  ;;  %821 = vrot.lane.b32.xlu1 %v2616_v60, %s2298_s7 }
0x2041   :  { %v1465_v17 = vld [vmem:[#allocation3 + $0x40] sm:$0xff] }
0x2042   :  { %979 = vrot.lane.b32.xlu1 %v2650_v20, %s2298_s7 }
0x2045   :  { %v1467_v19 = vld [vmem:[#allocation3 + $0x50] sm:$0xff] }
0x2046   :  { %1137 = vrot.lane.b32.xlu1 %v2684_v18, %s2298_s7 }
0x204a   :  { %1295 = vrot.lane.b32.xlu1 %v2716_v34, %s2298_s7 }
0x20a8   :  { %v1447_v25 = vpop.permute.xlu1 %1446 }
0x20a9   :  { %v1449_v59 = vmul.f32 %v1447_v25, %v1444_v24 }
0x20ab   :  { %v1451_v32 = vadd.f32 %v1450_v30, %v1449_v59 }
0x20ac   :  { %v664_v26 = vpop.permute.xlu1 %663 }
0x20ad   :  { %666 = vst.msk [vmem:[#allocation3 + $0x8] sm:$0xff] %vm513_vm9, %v664_v26  ;;  %1453 = vrot.lane.b32.xlu1 %v1451_v32, %s2298_s7  ;;  %v1597_v32 = vlaneseq }
0x20b0   :  { %v822_v60 = vpop.permute.xlu1 %821 }
0x20b1   :  { %824 = vst.msk [vmem:[#allocation3 + $0x18] sm:$0xff] %vm513_vm9, %v822_v60 }
0x20b4   :  { %v980_v20 = vpop.permute.xlu1 %979  ;;  %v1458_v28 = vld [vmem:[#allocation3 + $0x8] sm:$0xff] }
0x20b5   :  { %982 = vst.msk [vmem:[#allocation3 + $0x28] sm:$0xff] %vm513_vm9, %v980_v20  ;;  %v1469_v18 = vpack.c.bf16 %v1458_v28, %v1457_v27 }
0x20b7   :  { %2102 = vmatprep.mubr.msk.bf16.mxu1 %vm513_vm9, %v1469_v18 }
0x20b8   :  { %v1138_v0 = vpop.permute.xlu1 %1137  ;;  %v1460_v14 = vld [vmem:[#allocation3 + $0x18] sm:$0xff] }
0x20b9   :  { %1140 = vst.msk [vmem:[#allocation3 + $0x38] sm:$0xff] %vm513_vm9, %v1138_v0  ;;  %v1470_v34 = vpack.c.bf16 %v1460_v14, %v1459_v31  ;;  %v2818_v31 = vand.u32 127, %v1597_v32 }
0x20bb   :  { %2103 = vmatmul.mubr.msk.bf16.vlgmr.msra.gmra.mxu1 %vm513_vm9, %v1470_v34  ;;  %vm1767_vm10 = vcmp.eq.s32.totalorder %v2818_v31, 0  ;;  %vm1780_vm13 = vcmp.eq.s32.totalorder %v2818_v31, 2 }
0x20bc   :  { %v1296_v35 = vpop.permute.xlu1 %1295  ;;  %v1462_v36 = vld [vmem:[#allocation3 + $0x28] sm:$0xff] }
0x20bd   :  { %1298 = vst.msk [vmem:[#allocation3 + $0x48] sm:$0xff] %vm513_vm9, %v1296_v35  ;;  %v1471_v37 = vpack.c.bf16 %v1462_v36, %v1461_v15 }
0x20bf   :  { %2106 = vmatprep.mubr.msk.bf16.mxu1 %vm513_vm9, %v1471_v37 }
0x20c0   :  { %v1464_v38 = vld [vmem:[#allocation3 + $0x38] sm:$0xff] }
0x20c1   :  { %v1472_v39 = vpack.c.bf16 %v1464_v38, %v1463_v16 }
0x20c3   :  { %2107 = vmatmul.mubr.msk.bf16.gmra.mxu1 %vm513_vm9, %v1472_v39 }
0x20c4   :  { %v1466_v40 = vld [vmem:[#allocation3 + $0x48] sm:$0xff] }
0x20c5   :  { %v1473_v41 = vpack.c.bf16 %v1466_v40, %v1465_v17 }
0x20c7   :  { %2110 = vmatprep.mubr.msk.bf16.mxu1 %vm513_vm9, %v1473_v41 }
0x211f   :  { %v1454_v42 = vpop.permute.xlu1 %1453 }
0x2120   :  { %1456 = vst.msk [vmem:[#allocation3 + $0x58] sm:$0xff] %vm513_vm9, %v1454_v42 }
0x2127   :  { %v1468_v43 = vld [vmem:[#allocation3 + $0x58] sm:$0xff] }
0x2128   :  { %v1474_v44 = vpack.c.bf16 %v1468_v43, %v1467_v19 }
0x212a   :  { %2111 = vmatmul.mubr.msk.bf16.gmra.mxu1 %vm513_vm9, %v1474_v44 }
0x217b   :  { %v2104_v46 = vpop.f32.mrf.mxu1 }
0x217c   :  { %v2785_v47 = vadd.f32 %v2104_v46, %v2782_v45 }
0x217d   :  { %v1550_v48 = vpop.f32.mrf.mxu1 }
0x217e   :  { %v1613_v49 = vmin.f32 %v2785_v47, 20.0  ;;  %v2789_v33 = vadd.f32 %v2782_v45, %v1550_v48  ;;  %vm1601_vm11 = vcmp.gt.f32.partialorder %v2785_v47, 20.0 }
0x217f   :  { %v2105_v50 = vpop.f32.mrf.mxu1 }
0x2180   :  { %v1627_v51 = vmul.f32 1.442695, %v1613_v49  ;;  %v1611_v52 = vmin.f32 %v2789_v33, 20.0  ;;  %v2793_v54 = vadd.f32 %v2105_v50, %v2782_v45  ;;  %vm1599_vm14 = vcmp.gt.f32.partialorder %v2789_v33, 20.0 }
0x2181   :  { %v1553_v55 = vpop.f32.mrf.mxu1 }
0x2182   :  { %2219 = vpow2.f32 %v1627_v51  ;;  %v1623_v56 = vmul.f32 1.442695, %v1611_v52  ;;  %v1614_v58 = vmin.f32 %v2793_v54, 20.0  ;;  %v2797_v61 = vadd.f32 %v2782_v45, %v1553_v55 }
0x2183   :  { %v2108_v63 = vpop.f32.mrf.mxu1  ;;  %vm1602_vm15 = vcmp.gt.f32.partialorder %v2793_v54, 20.0 }
0x2184   :  { %2221 = vpow2.f32 %v1623_v56  ;;  %v1629_v1 = vmul.f32 1.442695, %v1614_v58  ;;  %v2800_v2 = vadd.f32 %v2108_v63, %v2782_v45  ;;  %v1612_v3 = vmin.f32 %v2797_v61, 20.0 }
0x2185   :  { %v1566_v4 = vpop.f32.mrf.mxu1  ;;  %vm1600_vm2 = vcmp.gt.f32.partialorder %v2797_v61, 20.0 }
0x2186   :  { %2223 = vpow2.f32 %v1629_v1  ;;  %v1617_v5 = vmin.f32 %v2800_v2, 20.0  ;;  %v2805_v6 = vadd.f32 %v2782_v45, %v1566_v4  ;;  %v1625_v7 = vmul.f32 1.442695, %v1612_v3 }
0x2187   :  { %v2109_v9 = vpop.f32.mrf.mxu1  ;;  %vm1605_vm4 = vcmp.gt.f32.partialorder %v2800_v2, 20.0 }
0x2188   :  { %v1635_v10 = vmul.f32 1.442695, %v1617_v5  ;;  %v1615_v21 = vmin.f32 %v2805_v6, 20.0  ;;  %v2809_v12 = vadd.f32 %v2109_v9, %v2782_v45  ;;  %2225 = vpow2.f32 %v1625_v7 }
0x2189   :  { %v1569_v13 = vpop.f32.mrf.mxu1  ;;  %vm1603_vm6 = vcmp.gt.f32.partialorder %v2805_v6, 20.0 }
0x218a   :  { %2227 = vpow2.f32 %v1635_v10  ;;  %v1631_v62 = vmul.f32 1.442695, %v1615_v21  ;;  %v1618_v57 = vmin.f32 %v2809_v12, 20.0  ;;  %v2813_v29 = vadd.f32 %v2782_v45, %v1569_v13 }
0x218b   :  { %vm1606_vm8 = vcmp.gt.f32.partialorder %v2809_v12, 20.0 }
0x218c   :  { %2229 = vpow2.f32 %v1631_v62  ;;  %v1637_v11 = vmul.f32 1.442695, %v1618_v57  ;;  %v1616_v8 = vmin.f32 %v2813_v29, 20.0 }
0x218e   :  { %2231 = vpow2.f32 %v1637_v11  ;;  %v1633_v53 = vmul.f32 1.442695, %v1616_v8 }
0x218f   :  { %v2220_v22 = vpop.eup %2219 }
0x2190   :  { %v1665_v23 = vadd.f32 1.0, %v2220_v22  ;;  %2233 = vpow2.f32 %v1633_v53  ;;  %v1668_v60 = vmul.f32 -0.5, %v2220_v22  ;;  %v1671_v14 = vand.u32 2147483647, %v2220_v22 }
0x2191   :  { %v2222_v24 = vpop.eup %2221 }
0x2192   :  { %2235 = vlog2.f32 %v1665_v23  ;;  %v1647_v25 = vadd.f32 1.0, %v2222_v24  ;;  %v1650_v28 = vmul.f32 -0.5, %v2222_v24  ;;  %v1669_v34 = vadd.f32 1.0, %v1668_v60 }
0x2193   :  { %v2224_v30 = vpop.eup %2223  ;;  %v1653_v37 = vand.u32 2147483647, %v2222_v24  ;;  %vm2826_vm12 = vcmp.lt.f32.partialorder %v1671_v14, 0.0004427343 }
0x2194   :  { %2237 = vlog2.f32 %v1647_v25  ;;  %v1674_v59 = vadd.f32 1.0, %v2224_v30  ;;  %v1677_v35 = vmul.f32 -0.5, %v2224_v30  ;;  %v1651_v39 = vadd.f32 1.0, %v1650_v28 }
0x2195   :  { %v2226_v26 = vpop.eup %2225  ;;  %v1680_v17 = vand.u32 2147483647, %v2224_v30  ;;  %v1670_v19 = vmul.f32 %v2220_v22, %v1669_v34  ;;  %vm2836_vm0 = vcmp.lt.f32.partialorder %v1653_v37, 0.0004427343 }
0x2196   :  { %2239 = vlog2.f32 %v1674_v59  ;;  %v1656_v27 = vadd.f32 1.0, %v2226_v26  ;;  %v1659_v16 = vmul.f32 -0.5, %v2226_v26  ;;  %v1678_v43 = vadd.f32 1.0, %v1677_v35 }
0x2197   :  { %v2228_v20 = vpop.eup %2227  ;;  %v1662_v44 = vand.u32 2147483647, %v2226_v26  ;;  %v1652_v55 = vmul.f32 %v2222_v24, %v1651_v39  ;;  %vm2840_vm1 = vcmp.lt.f32.partialorder %v1680_v17, 0.0004427343 }
0x2198   :  { %v1701_v18 = vadd.f32 1.0, %v2228_v20  ;;  %2241 = vlog2.f32 %v1656_v27  ;;  %v1704_v38 = vmul.f32 -0.5, %v2228_v20  ;;  %v1660_v48 = vadd.f32 1.0, %v1659_v16 }
0x2199   :  { %v2816_v0 = vpop.eup %2229  ;;  %v1707_v50 = vand.u32 2147483647, %v2228_v20  ;;  %v1679_v9 = vmul.f32 %v2224_v30, %v1678_v43  ;;  %vm2850_vm3 = vcmp.lt.f32.partialorder %v1662_v44, 0.0004427343 }
0x219a   :  { %2243 = vlog2.f32 %v1701_v18  ;;  %v1683_v15 = vadd.f32 1.0, %v2816_v0  ;;  %v1705_v49 = vadd.f32 1.0, %v1704_v38  ;;  %v1686_v1 = vmul.f32 -0.5, %v2816_v0 }
0x219b   :  { %v2821_v36 = vpop.eup %2231  ;;  %v1689_v3 = vand.u32 2147483647, %v2816_v0  ;;  %v1661_v62 = vmul.f32 %v2226_v26, %v1660_v48  ;;  %vm2858_vm5 = vcmp.lt.f32.partialorder %v1707_v50, 0.0004427343 }
0x219c   :  { %2245 = vlog2.f32 %v1683_v15  ;;  %v1710_v40 = vadd.f32 1.0, %v2821_v36  ;;  %v1713_v4 = vmul.f32 -0.5, %v2821_v36  ;;  %v1706_v57 = vmul.f32 %v2228_v20, %v1705_v49 }
0x219d   :  { %v2832_v42 = vpop.eup %2233  ;;  %v1687_v25 = vadd.f32 1.0, %v1686_v1  ;;  %vm2871_vm7 = vcmp.lt.f32.partialorder %v1689_v3, 0.0004427343  ;;  %v1716_v14 = vand.u32 2147483647, %v2821_v36 }
0x219e   :  { %2247 = vlog2.f32 %v1710_v40  ;;  %v1692_v51 = vadd.f32 1.0, %v2832_v42  ;;  %v1714_v59 = vadd.f32 1.0, %v1713_v4  ;;  %v1695_v34 = vmul.f32 -0.5, %v2832_v42 }
0x219f   :  { %v2236_v46 = vpop.eup %2235  ;;  %v1688_v39 = vmul.f32 %v2816_v0, %v1687_v25  ;;  %v1698_v40 = vand.u32 2147483647, %v2832_v42  ;;  %vm1717_vm9 = vcmp.lt.f32.partialorder %v1716_v14, 0.0004427343 }
0x21a0   :  { %v1667_v52 = vmul.f32 0.6931472, %v2236_v46  ;;  %2249 = vlog2.f32 %v1692_v51  ;;  %v1715_v17 = vmul.f32 %v2821_v36, %v1714_v59  ;;  %v1696_v48 = vadd.f32 1.0, %v1695_v34 }
0x21a1   :  { %v2238_v63 = vpop.eup %2237 }
0x21a2   :  { %v1673_v5 = vsel %vm2826_vm12, %v1670_v19, %v1667_v52  ;;  %v1649_v7 = vmul.f32 0.6931472, %v2238_v63  ;;  %vm1604_vm12 = vcmp.gt.f32.partialorder %v2813_v29, 20.0 }
0x21a3   :  { %v2240_v21 = vpop.eup %2239  ;;  %v1757_v13 = vsel %vm1601_vm11, %v2785_v47, %v1673_v5  ;;  %v1697_v5 = vmul.f32 %v2832_v42, %v1696_v48  ;;  %vm1699_vm11 = vcmp.lt.f32.partialorder %v1698_v40, 0.0004427343 }
0x21a4   :  { %v1770_v8 = vadd.f32 2.0, %v1757_v13  ;;  %v1783_v22 = vsel %vm1780_vm13, %v1757_v13, %v2785_v47  ;;  %v1655_v53 = vsel %vm2836_vm0, %v1652_v55, %v1649_v7  ;;  %v1676_v23 = vmul.f32 0.6931472, %v2240_v21 }
0x21a5   :  { %v1755_v24 = vsel %vm1599_vm14, %v2789_v33, %v1655_v53  ;;  %v2242_v32 = vpop.eup %2241 }
0x21a6   :  { %v1795_v47 = vsel %vm1767_vm10, %v1770_v8, %v1783_v22  ;;  %v1768_v26 = vadd.f32 2.0, %v1755_v24  ;;  %v1781_v60 = vsel %vm1780_vm13, %v1755_v24, %v2789_v33  ;;  %v1682_v20 = vsel %vm2840_vm1, %v1679_v9, %v1676_v23 }
0x21a7   :  { %v2244_v27 = vpop.eup %2243  ;;  %1807 = vst [vmem:[#allocation4 + $0x10] sm:$0xff] %v1795_v47  ;;  %v1758_v28 = vsel %vm1602_vm15, %v2793_v54, %v1682_v20  ;;  %v1658_v18 = vmul.f32 0.6931472, %v2242_v32 }
0x21a8   :  { %v1793_v35 = vsel %vm1767_vm10, %v1768_v26, %v1781_v60  ;;  %v1771_v15 = vadd.f32 2.0, %v1758_v28  ;;  %v1784_v33 = vsel %vm1780_vm13, %v1758_v28, %v2793_v54  ;;  %v1703_v37 = vmul.f32 0.6931472, %v2244_v27 }
0x21a9   :  { %v2246_v16 = vpop.eup %2245  ;;  %1805 = vst [vmem:[#allocation4] sm:$0xff] %v1793_v35  ;;  %v1664_v38 = vsel %vm2850_vm3, %v1661_v62, %v1658_v18 }
0x21aa   :  { %v1796_v41 = vsel %vm1767_vm10, %v1771_v15, %v1784_v33  ;;  %v1756_v19 = vsel %vm1600_vm2, %v2797_v61, %v1664_v38  ;;  %v1709_v54 = vsel %vm2858_vm5, %v1706_v57, %v1703_v37  ;;  %v1685_v43 = vmul.f32 0.6931472, %v2246_v16 }
0x21ab   :  { %v2248_v44 = vpop.eup %2247  ;;  %1808 = vst [vmem:[#allocation4 + $0x18] sm:$0xff] %v1796_v41  ;;  %v1769_v46 = vadd.f32 2.0, %v1756_v19  ;;  %v1782_v0 = vsel %vm1780_vm13, %v1756_v19, %v2797_v61  ;;  %v1761_v36 = vsel %vm1605_vm4, %v2800_v2, %v1709_v54 }
0x21ac   :  { %v1774_v49 = vadd.f32 2.0, %v1761_v36  ;;  %v1787_v50 = vsel %vm1780_vm13, %v1761_v36, %v2800_v2  ;;  %v1691_v51 = vsel %vm2871_vm7, %v1688_v39, %v1685_v43  ;;  %v1712_v52 = vmul.f32 0.6931472, %v2248_v44 }
0x21ad   :  { %v1794_v55 = vsel %vm1767_vm10, %v1769_v46, %v1782_v0  ;;  %v1759_v61 = vsel %vm1603_vm6, %v2805_v6, %v1691_v51  ;;  %v2250_v56 = vpop.eup %2249 }
0x21ae   :  { %1806 = vst [vmem:[#allocation4 + $0x8] sm:$0xff] %v1794_v55  ;;  %v1799_v58 = vsel %vm1767_vm10, %v1774_v49, %v1787_v50  ;;  %v1772_v2 = vadd.f32 2.0, %v1759_v61  ;;  %v1785_v63 = vsel %vm1780_vm13, %v1759_v61, %v2805_v6  ;;  %v1718_v1 = vsel %vm1717_vm9, %v1715_v17, %v1712_v52 }
0x21af   :  { %1811 = vst [vmem:[#allocation4 + $0x30] sm:$0xff] %v1799_v58  ;;  %v1762_v3 = vsel %vm1606_vm8, %v2809_v12, %v1718_v1  ;;  %v1694_v4 = vmul.f32 0.6931472, %v2250_v56 }
0x21b0   :  { %v1797_v7 = vsel %vm1767_vm10, %v1772_v2, %v1785_v63  ;;  %v1775_v9 = vadd.f32 2.0, %v1762_v3  ;;  %v1788_v10 = vsel %vm1780_vm13, %v1762_v3, %v2809_v12 }
0x21b1   :  { %1809 = vst [vmem:[#allocation4 + $0x20] sm:$0xff] %v1797_v7  ;;  %v1700_v6 = vsel %vm1699_vm11, %v1697_v5, %v1694_v4 }
0x21b2   :  { %v1800_v21 = vsel %vm1767_vm10, %v1775_v9, %v1788_v10  ;;  %v1760_v13 = vsel %vm1604_vm12, %v2813_v29, %v1700_v6 }
0x21b3   :  { %1812 = vst [vmem:[#allocation4 + $0x38] sm:$0xff] %v1800_v21  ;;  %v1773_v42 = vadd.f32 2.0, %v1760_v13  ;;  %v1786_v62 = vsel %vm1780_vm13, %v1760_v13, %v2813_v29 }
0x21b5   :  { %v1798_v57 = vsel %vm1767_vm10, %v1773_v42, %v1786_v62 }
0x21b6   :  { %1810 = vst [vmem:[#allocation4 + $0x28] sm:$0xff] %v1798_v57 }
0x21ea   :  { %v2112_v12 = vpop.f32.mrf.mxu1 }
0x21eb   :  { %v1591_v11 = vadd.f32 %v2112_v12, %v2782_v45 }
0x21ec   :  { %v1582_v8 = vpop.f32.mrf.mxu1 }
0x21ed   :  { %v1621_v22 = vmin.f32 %v1591_v11, 20.0  ;;  %v2944_v53 = vadd.f32 %v2782_v45, %v1582_v8  ;;  %vm1609_vm14 = vcmp.gt.f32.partialorder %v1591_v11, 20.0 }
0x21ee   :  { %v2113_v23 = vpop.f32.mrf.mxu1 }
0x21ef   :  { %v1643_v24 = vmul.f32 1.442695, %v1621_v22  ;;  %v1619_v25 = vmin.f32 %v2944_v53, 20.0  ;;  %v2948_v30 = vadd.f32 %v2113_v23, %v2782_v45  ;;  %vm1607_vm0 = vcmp.gt.f32.partialorder %v2944_v53, 20.0 }
0x21f0   :  { %v1585_v29 = vpop.f32.mrf.mxu1 }
0x21f1   :  { %2251 = vpow2.f32 %v1643_v24  ;;  %v1639_v59 = vmul.f32 1.442695, %v1619_v25  ;;  %v1622_v32 = vmin.f32 %v2948_v30, 20.0  ;;  %v2952_v47 = vadd.f32 %v2782_v45, %v1585_v29 }
0x21f2   :  { %vm1610_vm2 = vcmp.gt.f32.partialorder %v2948_v30, 20.0 }
0x21f3   :  { %2253 = vpow2.f32 %v1639_v59  ;;  %v1645_v26 = vmul.f32 1.442695, %v1622_v32  ;;  %v1620_v60 = vmin.f32 %v2952_v47, 20.0  ;;  %vm1608_vm5 = vcmp.gt.f32.partialorder %v2952_v47, 20.0 }
0x21f5   :  { %2255 = vpow2.f32 %v1645_v26  ;;  %v1641_v20 = vmul.f32 1.442695, %v1620_v60 }
0x21f7   :  { %2257 = vpow2.f32 %v1641_v20 }
0x21fe   :  { %v2252_v27 = vpop.eup %2251 }
0x21ff   :  { %v1737_v28 = vadd.f32 1.0, %v2252_v27  ;;  %v1740_v45 = vmul.f32 -0.5, %v2252_v27  ;;  %v1743_v39 = vand.u32 2147483647, %v2252_v27 }
0x2200   :  { %v2254_v18 = vpop.eup %2253 }
0x2201   :  { %2259 = vlog2.f32 %v1737_v28  ;;  %v1719_v14 = vadd.f32 1.0, %v2254_v18  ;;  %v1722_v37 = vmul.f32 -0.5, %v2254_v18  ;;  %v1741_v38 = vadd.f32 1.0, %v1740_v45 }
0x2202   :  { %v2256_v34 = vpop.eup %2255  ;;  %v1725_v40 = vand.u32 2147483647, %v2254_v18  ;;  %vm1744_vm15 = vcmp.lt.f32.partialorder %v1743_v39, 0.0004427343 }
0x2203   :  { %2261 = vlog2.f32 %v1719_v14  ;;  %v1746_v35 = vadd.f32 1.0, %v2256_v34  ;;  %v1749_v16 = vmul.f32 -0.5, %v2256_v34  ;;  %v1723_v17 = vadd.f32 1.0, %v1722_v37 }
0x2204   :  { %v2258_v15 = vpop.eup %2257  ;;  %v1742_v44 = vmul.f32 %v2252_v27, %v1741_v38  ;;  %v1752_v0 = vand.u32 2147483647, %v2256_v34  ;;  %vm1726_vm1 = vcmp.lt.f32.partialorder %v1725_v40, 0.0004427343 }
0x2205   :  { %2263 = vlog2.f32 %v1746_v35  ;;  %v1728_v33 = vadd.f32 1.0, %v2258_v15  ;;  %v1750_v19 = vadd.f32 1.0, %v1749_v16  ;;  %v1731_v54 = vmul.f32 -0.5, %v2258_v15 }
0x2206   :  { %v1724_v49 = vmul.f32 %v2254_v18, %v1723_v17  ;;  %v1734_v61 = vand.u32 2147483647, %v2258_v15  ;;  %vm1753_vm3 = vcmp.lt.f32.partialorder %v1752_v0, 0.0004427343 }
0x2207   :  { %2265 = vlog2.f32 %v1728_v33  ;;  %v1751_v52 = vmul.f32 %v2256_v34, %v1750_v19  ;;  %v1732_v55 = vadd.f32 1.0, %v1731_v54 }
0x2208   :  { %vm1735_vm4 = vcmp.lt.f32.partialorder %v1734_v61, 0.0004427343 }
0x2209   :  { %v1733_v21 = vmul.f32 %v2258_v15, %v1732_v55 }
0x220e   :  { %v2260_v41 = vpop.eup %2259 }
0x220f   :  { %v1739_v43 = vmul.f32 0.6931472, %v2260_v41 }
0x2210   :  { %v2262_v46 = vpop.eup %2261 }
0x2211   :  { %v1745_v36 = vsel %vm1744_vm15, %v1742_v44, %v1739_v43  ;;  %v1721_v48 = vmul.f32 0.6931472, %v2262_v46 }
0x2212   :  { %v2264_v50 = vpop.eup %2263  ;;  %v1765_v51 = vsel %vm1609_vm14, %v1591_v11, %v1745_v36 }
0x2213   :  { %v1778_v56 = vadd.f32 2.0, %v1765_v51  ;;  %v1791_v58 = vsel %vm1780_vm13, %v1765_v51, %v1591_v11  ;;  %v1727_v2 = vsel %vm1726_vm1, %v1724_v49, %v1721_v48  ;;  %v1748_v63 = vmul.f32 0.6931472, %v2264_v50 }
0x2214   :  { %v1763_v1 = vsel %vm1607_vm0, %v2944_v53, %v1727_v2  ;;  %v2266_v3 = vpop.eup %2265 }
0x2215   :  { %v1803_v4 = vsel %vm1767_vm10, %v1778_v56, %v1791_v58  ;;  %v1776_v5 = vadd.f32 2.0, %v1763_v1  ;;  %v1789_v7 = vsel %vm1780_vm13, %v1763_v1, %v2944_v53  ;;  %v1754_v9 = vsel %vm1753_vm3, %v1751_v52, %v1748_v63 }
0x2216   :  { %1815 = vst [vmem:[#allocation4 + $0x50] sm:$0xff] %v1803_v4  ;;  %v1766_v10 = vsel %vm1610_vm2, %v2948_v30, %v1754_v9  ;;  %v1730_v6 = vmul.f32 0.6931472, %v2266_v3 }
0x2217   :  { %v1801_v13 = vsel %vm1767_vm10, %v1776_v5, %v1789_v7  ;;  %v1779_v42 = vadd.f32 2.0, %v1766_v10  ;;  %v1792_v62 = vsel %vm1780_vm13, %v1766_v10, %v2948_v30 }
0x2218   :  { %1813 = vst [vmem:[#allocation4 + $0x40] sm:$0xff] %v1801_v13  ;;  %v1736_v57 = vsel %vm1735_vm4, %v1733_v21, %v1730_v6 }
0x2219   :  { %v1804_v12 = vsel %vm1767_vm10, %v1779_v42, %v1792_v62  ;;  %v1764_v11 = vsel %vm1608_vm5, %v2952_v47, %v1736_v57 }
0x221a   :  { %1816 = vst [vmem:[#allocation4 + $0x58] sm:$0xff] %v1804_v12  ;;  %v1777_v8 = vadd.f32 2.0, %v1764_v11  ;;  %v1790_v22 = vsel %vm1780_vm13, %v1764_v11, %v2952_v47 }
0x221c   :  { %v1802_v53 = vsel %vm1767_vm10, %v1777_v8, %v1790_v22 }
0x221d   :  { %1814 = vst [vmem:[#allocation4 + $0x48] sm:$0xff] %v1802_v53 }
0x221e   :  { %2278 = shalt.err (!%p2275_p4)
}
0x221f   :  { %1826 = dma.vmem_to_hbm [thread:$0]  %s1824_s5, 1536, %s2994_s11, [#allocation5]  }
0x2220   :  { %2287 = dma.done.wait [#allocation5], 1536  }
0x2221   :  { %2288 = vsyncadd [#allocation5], 4294965760 }
0x2222   :  { %1834 = vsyncpa [#allocation5], 1 }

</bundles_post_ra>
